<compile_context>
chip_gen: v7x
topology: tpu7x:2x2x1
jax: 0.10.0
libtpu: 0.0.40
codegen_flags: <defaults>
</compile_context>

<pallas_src>
import math
import numpy as np
import jax
import jax.numpy as jnp
from jax.experimental import pallas as pl
from jax.experimental.pallas import tpu as pltpu

# -------------------- sizes --------------------
B = 2         # batch
L = 8         # max_session_len
E = 128       # embedding_size
N_NODE = 64   # vocabulary size
STEP = 2      # GNN propagation steps (model_opt.num_layers)

F32 = jnp.float32
BF16 = jnp.bfloat16


# -------------------- host-side graph construction (mirrors _get_slice) --------------------
def get_slice_np(item_seq):
    item_seq = np.asarray(item_seq)
    bsz, max_n_node = item_seq.shape
    mask = (item_seq > 0)
    items, A, alias_inputs = [], [], []
    for u_input in item_seq:
        node = np.unique(u_input)
        items.append(node.tolist() + (max_n_node - len(node)) * [0])
        u_A = np.zeros((max_n_node, max_n_node))
        for i in np.arange(len(u_input) - 1):
            if u_input[i + 1] == 0:
                break
            u = np.where(node == u_input[i])[0][0]
            v = np.where(node == u_input[i + 1])[0][0]
            u_A[u][v] = 1
        u_sum_in = np.sum(u_A, 0)
        u_sum_in[np.where(u_sum_in == 0)] = 1
        u_A_in = np.divide(u_A, u_sum_in)
        u_sum_out = np.sum(u_A, 1)
        u_sum_out[np.where(u_sum_out == 0)] = 1
        u_A_out = np.divide(u_A.transpose(), u_sum_out)
        u_A_cat = np.concatenate([u_A_in, u_A_out]).transpose()   # (L, 2L)
        A.append(u_A_cat)
        alias_inputs.append([np.where(node == i)[0][0] for i in u_input])
    return (np.asarray(alias_inputs, np.int32),
            np.asarray(A, np.float32),
            np.asarray(items, np.int32),
            mask.astype(np.float32))


# -------------------- fused Pallas kernel --------------------
def srgnn_fused_kernel(a_ref, h0_ref, alias_sel_ref, ht_sel_ref, mask_ref,
                       w_edge_ref, b_edge_ref,
                       w_gru_ref, b_gru_ref,
                       w_q12_ref, b_q12_ref, w3_ref,
                       w_tr_ref, b_tr_ref,
                       out_ref, h_scr):
    tb, l, e = h0_ref.shape           # (TB, L, E)
    m = tb * l

    # adjacency: A_in stacked over A_out along sublanes -> tile-aligned slices
    a_cat = a_ref[...]                                        # (TB, 2L, L) f32
    a_in = a_cat[:, :l, :].astype(BF16)                       # (TB, L, L)
    a_out = a_cat[:, l:, :].astype(BF16)                      # (TB, L, L)

    # hidden kept resident in VMEM scratch as (TB*L, E) f32 across all steps
    h_scr[...] = h0_ref[...].reshape(m, e)

    for _ in range(STEP):                                     # static unroll (STEP=2)
        h = h_scr[...]                                        # (m, e) f32
        hb = h.astype(BF16)

        # fused edge-in|edge-out projection: one (m,E)@(E,2E) matmul
        edge = jnp.dot(hb, w_edge_ref[...],
                       preferred_element_type=F32) + b_edge_ref[...]      # (m, 2e)
        edge3 = edge.reshape(tb, l, 2 * e).astype(BF16)

        # per-session graph propagation (batched, tiny K=L matmuls, bf16 MXU)
        inp_in = jnp.einsum('bql,ble->bqe', a_in, edge3[:, :, :e],
                            preferred_element_type=F32).reshape(m, e)
        inp_out = jnp.einsum('bql,ble->bqe', a_out, edge3[:, :, e:],
                             preferred_element_type=F32).reshape(m, e)

        # ONE fused GRU matmul with K = 3E:
        #   [inp_in | inp_out | h] @ w_gru + b_gru -> (m, 4e)
        # output columns: [i_r+h_r | i_i+h_i | i_n | h_n]; b_iah/b_ioh folded host-side.
        x_cat = jnp.concatenate([inp_in.astype(BF16), inp_out.astype(BF16), hb], axis=1)
        g = jnp.dot(x_cat, w_gru_ref[...],
                    preferred_element_type=F32) + b_gru_ref[...]          # (m, 4e)

        reset_gate = jax.nn.sigmoid(g[:, :e])
        input_gate = jax.nn.sigmoid(g[:, e:2 * e])
        new_gate = jnp.tanh(g[:, 2 * e:3 * e] + reset_gate * g[:, 3 * e:])
        h_scr[...] = (1.0 - input_gate) * h + input_gate * new_gate

    # ---- readout ----
    hid = h_scr[...].reshape(tb, l, e)                                    # (TB, L, E) f32
    alias_sel = alias_sel_ref[...]                                        # (TB, L, L) one-hot
    ht_sel = ht_sel_ref[...]                                              # (TB, L, 1) one-hot

    # alias permutation on the VPU (L broadcast-multiply-adds); exact f32, no MXU dispatch
    seq_hidden = jnp.zeros((tb, l, e), F32)
    for j in range(l):
        seq_hidden = seq_hidden + alias_sel[:, :, j:j + 1] * hid[:, j:j + 1, :]

    ht = jnp.sum(ht_sel * seq_hidden, axis=1)                             # (TB, E)

    # q2 and q1 from ONE matmul: seq_hidden @ [w_two.T | w_one.T];
    # q1 = last-position row of the right half (one-hot selection is exact).
    q12 = (jnp.dot(seq_hidden.reshape(m, e).astype(BF16), w_q12_ref[...],
                   preferred_element_type=F32) + b_q12_ref[...]).reshape(tb, l, 2 * e)
    q2 = q12[:, :, :e]                                                    # (TB, L, E)
    q1 = jnp.sum(ht_sel * q12[:, :, e:], axis=1)                          # (TB, E)

    gate = jax.nn.sigmoid(q1[:, None, :] + q2)                            # (TB, L, E)
    # linear_three as a VPU lane reduction instead of an N=1 MXU matmul
    alpha = jnp.sum(gate * w3_ref[...], axis=-1, keepdims=True)           # (TB, L, 1)
    a_vec = jnp.sum(alpha * seq_hidden * mask_ref[...], axis=1)           # (TB, E)

    # fused final transform: [a | ht] @ w_trans.T + b_trans (single dot)
    out_ref[...] = (jnp.dot(jnp.concatenate([a_vec, ht], axis=1).astype(BF16),
                            w_tr_ref[...], preferred_element_type=F32)
                    + b_tr_ref[...])


# -------------------- pallas_call wrapper --------------------
def _per_batch_spec(shape):
    n0 = len(shape) - 1

    def imap(b):
        return (b,) + (0,) * n0
    return pl.BlockSpec(shape, imap)


def _shared_spec(shape):
    n = len(shape)

    def imap(b):
        return (0,) * n
    return pl.BlockSpec(shape, imap)


def _choose_tb(bsz, l, target_rows=1024, min_rows_per_shard=128):
    """Generation-aware TB selection (perf review):
    - collapse the grid to a single step (TB = B) for single-TC chips (v5e/v6e),
    - only split 2-way (v7x's 2 TCs) when each shard still gets >= min_rows_per_shard rows,
    - cap TB so per-step intermediates stay modest for very large batches.
    NOTE: assumes bsz has a suitable divisor; prime batch sizes degrade to small TB
    (padding the batch would be the fix)."""
    divs = [d for d in range(1, bsz + 1) if bsz % d == 0]
    two_way = [d for d in divs
               if bsz // d == 2 and d * l >= min_rows_per_shard and d * l <= target_rows]
    if two_way:
        return max(two_way)
    fits = [d for d in divs if d * l <= target_rows]
    return max(fits) if fits else 1


def _cost_estimate(bsz, l, e):
    m = bsz * l
    per_step = (2 * m * e * (2 * e)               # edge projection
                + 2 * (2 * bsz * l * l * e)       # adjacency propagation
                + 2 * m * (3 * e) * (4 * e))      # fused GRU matmul
    flops = (STEP * per_step
             + 2 * m * e * (2 * e)                # q12 matmul
             + 2 * bsz * (2 * e) * e              # final transform
             + 12 * m * e)                        # VPU alias/attention epsilon
    transcendentals = STEP * 3 * m * e + m * e
    bytes_in = 4 * (bsz * 2 * l * l + m * e + bsz * l * l + 2 * bsz * l)
    bytes_w = 2 * (e * 2 * e + 3 * e * 4 * e + e * 2 * e + 2 * e * e) + 4 * (9 * e)
    bytes_out = 4 * bsz * e
    return pl.CostEstimate(flops=int(flops), transcendentals=int(transcendentals),
                           bytes_accessed=int(bytes_in + bytes_w + bytes_out))


def srgnn_fused_pallas(a_stack, hidden0, alias_sel, ht_sel, mask3, kp):
    bsz, l, e = hidden0.shape
    tb = _choose_tb(bsz, l)
    grid = (bsz // tb,)

    in_specs = [
        _per_batch_spec((tb, 2 * l, l)),      # A (A_in stacked over A_out)
        _per_batch_spec((tb, l, e)),          # hidden0
        _per_batch_spec((tb, l, l)),          # alias one-hot
        _per_batch_spec((tb, l, 1)),          # last-position one-hot
        _per_batch_spec((tb, l, 1)),          # mask
        _shared_spec((e, 2 * e)),             # w_edge (in|out fused)
        _shared_spec((1, 2 * e)),             # b_edge
        _shared_spec((3 * e, 4 * e)),         # w_gru (fused [w_ih_a; w_ih_b; w_hh] -> 4E gates)
        _shared_spec((1, 4 * e)),             # b_gru (all GRU biases folded)
        _shared_spec((e, 2 * e)),             # w_q12 = [w_two.T | w_one.T]
        _shared_spec((1, 2 * e)),             # b_q12 = [b_two | b_one]
        _shared_spec((1, e)),                 # w_three (row, used on VPU)
        _shared_spec((2 * e, e)),             # w_trans.T
        _shared_spec((1, e)),                 # b_trans
    ]
    args = (a_stack, hidden0, alias_sel, ht_sel, mask3,
            kp['w_edge'], kp['b_edge'],
            kp['w_gru'], kp['b_gru'],
            kp['w_q12'], kp['b_q12'], kp['w3'],
            kp['w_tr'], kp['b_tr'])

    return pl.pallas_call(
        srgnn_fused_kernel,
        out_shape=jax.ShapeDtypeStruct((bsz, e), F32),
        grid=grid,
        in_specs=in_specs,
        out_specs=pl.BlockSpec((tb, e), lambda b: (b, 0)),
        scratch_shapes=[pltpu.VMEM((tb * l, e), F32)],
        compiler_params=pltpu.CompilerParams(dimension_semantics=("parallel",)),
        cost_estimate=_cost_estimate(bsz, l, e),
    )(*args)


# -------------------- parameters (deterministic, matches PyTorch shapes) --------------------
def init_params(key, n_node, e):
    stdv = 1.0 / math.sqrt(e)
    shapes = {
        'emb': (n_node, e),
        'w_ih': (3 * e, 2 * e), 'w_hh': (3 * e, e),
        'b_ih': (3 * e,), 'b_hh': (3 * e,), 'b_iah': (e,), 'b_ioh': (e,),
        'w_edge_in': (e, e), 'b_edge_in': (e,),
        'w_edge_out': (e, e), 'b_edge_out': (e,),
        'w_one': (e, e), 'b_one': (e,),
        'w_two': (e, e), 'b_two': (e,),
        'w_three': (1, e),
        'w_trans': (e, 2 * e), 'b_trans': (e,),
    }
    keys = jax.random.split(key, len(shapes))
    return {name: jax.random.uniform(k, s, F32, -stdv, stdv)
            for (name, s), k in zip(shapes.items(), keys)}


def prepare_kernel_params(p):
    """One-time weight prep (transposes / stacking / bias folding / bf16 cast), hoisted
    out of the per-call path."""
    e = p['emb'].shape[1]
    w_ih_t = p['w_ih'].T            # (2E, 3E) -- rows: [input_in part ; input_out part]
    w_hh_t = p['w_hh'].T            # (E, 3E)
    w_ih_a = w_ih_t[:e]             # (E, 3E)
    w_ih_b = w_ih_t[e:]             # (E, 3E)

    # fold b_iah / b_ioh through w_ih:  gi = in_in@Wa + in_out@Wb + (b_ih + b_iah@Wa + b_ioh@Wb)
    b_ih_eff = (p['b_ih'][None, :]
                + p['b_iah'][None, :] @ w_ih_a
                + p['b_ioh'][None, :] @ w_ih_b)            # (1, 3E)
    b_hh = p['b_hh'][None, :]                              # (1, 3E)

    # fused GRU weight: rows = [inp_in ; inp_out ; hidden], cols = [r-sum | z-sum | i_n | h_n]
    w_gru = jnp.concatenate([
        jnp.concatenate([w_ih_t[:, :2 * e], w_ih_t[:, 2 * e:], jnp.zeros((2 * e, e), F32)], axis=1),
        jnp.concatenate([w_hh_t[:, :2 * e], jnp.zeros((e, e), F32), w_hh_t[:, 2 * e:]], axis=1),
    ], axis=0)                                             # (3E, 4E)
    b_gru = jnp.concatenate([
        b_ih_eff[:, :2 * e] + b_hh[:, :2 * e],             # r-sum, z-sum biases
        b_ih_eff[:, 2 * e:],                               # i_n bias
        b_hh[:, 2 * e:],                                   # h_n bias
    ], axis=1)                                             # (1, 4E)

    kp = {
        'emb': p['emb'].astype(F32),
        'w_edge': jnp.concatenate([p['w_edge_in'].T, p['w_edge_out'].T], axis=1).astype(BF16),
        'b_edge': jnp.concatenate([p['b_edge_in'], p['b_edge_out']])[None, :].astype(F32),
        'w_gru': w_gru.astype(BF16),
        'b_gru': b_gru.astype(F32),
        'w_q12': jnp.concatenate([p['w_two'].T, p['w_one'].T], axis=1).astype(BF16),  # (E, 2E)
        'b_q12': jnp.concatenate([p['b_two'], p['b_one']])[None, :].astype(F32),      # (1, 2E)
        'w3': p['w_three'].astype(F32),
        'w_tr': p['w_trans'].T.astype(BF16),                                          # (2E, E)
        'b_tr': p['b_trans'][None, :].astype(F32),
    }
    return {k: jnp.asarray(v) for k, v in kp.items()}


# -------------------- SRGNN forward --------------------
def srgnn_forward(item_seq, item_seq_len, kp):
    # host-side, data-dependent session-graph construction (no Pallas equivalent)
    alias_np, A_np, items_np, mask_np = get_slice_np(np.asarray(item_seq))
    bsz, l = items_np.shape

    # stack A_in over A_out along the sublane axis -> single per-batch block, tile-aligned split
    a_stack = jnp.asarray(np.concatenate([A_np[:, :, :l], A_np[:, :, l:]], axis=1))  # (B, 2L, L)
    items = jnp.asarray(items_np)
    mask3 = jnp.asarray(mask_np)[:, :, None].astype(F32)                              # (B, L, 1)

    hidden0 = kp['emb'][items]                     # embedding gather (glue)
    # TODO(synk): emb_dropout is identity in eval mode; training-mode dropout not implemented.

    # exact one-hot selection matrices so the alias / last-position gathers happen in-kernel
    alias_sel = jax.nn.one_hot(jnp.asarray(alias_np), l, dtype=F32)                   # (B, L, L)
    ht_sel = jax.nn.one_hot(item_seq_len - 1, l, dtype=F32)[:, :, None]               # (B, L, 1)

    seq_output = srgnn_fused_pallas(a_stack, hidden0, alias_sel, ht_sel, mask3, kp)   # (B, E)
    return seq_output, kp['emb'].T                 # (E, n_node)


# -------------------- pure numpy reference (for verification) --------------------
def ref_forward(item_seq_np, lens_np, p):
    alias, A, items, mask = get_slice_np(item_seq_np)
    A = A.astype(np.float64)
    f = lambda x: np.asarray(x, np.float64)
    sig = lambda x: 1.0 / (1.0 + np.exp(-x))
    hidden = f(p['emb'])[items]
    bsz, l, e = hidden.shape
    lin = lambda x, w, b=None: (x @ f(w).T + (f(b) if b is not None else 0.0))
    for _ in range(STEP):
        input_in = A[:, :, :l] @ lin(hidden, p['w_edge_in'], p['b_edge_in']) + f(p['b_iah'])
        input_out = A[:, :, l:] @ lin(hidden, p['w_edge_out'], p['b_edge_out']) + f(p['b_ioh'])
        inputs = np.concatenate([input_in, input_out], axis=2)
        gi = lin(inputs, p['w_ih'], p['b_ih'])
        gh = lin(hidden, p['w_hh'], p['b_hh'])
        i_r, i_i, i_n = np.split(gi, 3, axis=2)
        h_r, h_i, h_n = np.split(gh, 3, axis=2)
        r = sig(i_r + h_r)
        z = sig(i_i + h_i)
        n = np.tanh(i_n + r * h_n)
        hidden = (1 - z) * hidden + z * n
    seq_hidden = np.take_along_axis(hidden, alias[:, :, None].repeat(e, 2), axis=1)
    ht = seq_hidden[np.arange(bsz), lens_np - 1]
    q1 = lin(ht, p['w_one'], p['b_one'])[:, None, :]
    q2 = lin(seq_hidden, p['w_two'], p['b_two'])
    alpha = sig(q1 + q2) @ f(p['w_three']).T
    a = np.sum(alpha * seq_hidden * mask[:, :, None], axis=1)
    seq_out = lin(np.concatenate([a, ht], axis=1), p['w_trans'], p['b_trans'])
    return seq_out


# -------------------- main --------------------
if __name__ == "__main__":
    key = jax.random.PRNGKey(0)
    k_param, k_seq = jax.random.split(key)

    params = init_params(k_param, N_NODE, E)
    kparams = prepare_kernel_params(params)        # hoisted one-time weight prep

    # deterministic item sequences: nonzero prefix, zero padding
    raw = jax.random.randint(k_seq, (B, L), 1, N_NODE)
    item_seq_len = jnp.array([6, 4], dtype=jnp.int32)
    pos = jnp.arange(L)[None, :]
    item_seq = jnp.where(pos < item_seq_len[:, None], raw, 0).astype(jnp.int32)

    seq_output, item_emb_t = srgnn_forward(item_seq, item_seq_len, kparams)
    seq_output = jax.block_until_ready(seq_output)
    item_emb_t = jax.block_until_ready(item_emb_t)

    ref = ref_forward(np.asarray(item_seq), np.asarray(item_seq_len), params)
    # bf16 MXU operands with f32 accumulation -> slightly looser tolerance vs f64 reference
    np.testing.assert_allclose(np.asarray(seq_output), ref, rtol=1e-2, atol=1e-2)
    assert item_emb_t.shape == (E, N_NODE)

    print("KERNEL_OK")
</pallas_src>

<mosaic_0001>
module attributes {stable_mosaic.version = 11 : i64} {
  func.func @srgnn_fused_kernel(%arg0: i32, %arg1: memref<2x16x8xf32, #tpu.memory_space<vmem>>, %arg2: memref<2x8x128xf32, #tpu.memory_space<vmem>>, %arg3: memref<2x8x8xf32, #tpu.memory_space<vmem>>, %arg4: memref<2x8x1xf32, #tpu.memory_space<vmem>>, %arg5: memref<2x8x1xf32, #tpu.memory_space<vmem>>, %arg6: memref<128x256xbf16, #tpu.memory_space<vmem>>, %arg7: memref<1x256xf32, #tpu.memory_space<vmem>>, %arg8: memref<384x512xbf16, #tpu.memory_space<vmem>>, %arg9: memref<1x512xf32, #tpu.memory_space<vmem>>, %arg10: memref<128x256xbf16, #tpu.memory_space<vmem>>, %arg11: memref<1x256xf32, #tpu.memory_space<vmem>>, %arg12: memref<1x128xf32, #tpu.memory_space<vmem>>, %arg13: memref<256x128xbf16, #tpu.memory_space<vmem>>, %arg14: memref<1x128xf32, #tpu.memory_space<vmem>>, %arg15: memref<2x128xf32, #tpu.memory_space<vmem>>, %arg16: memref<16x128xf32, #tpu.memory_space<vmem>>) attributes {dimension_semantics = [#tpu.dimension_semantics<parallel>], iteration_bounds = array<i64: 1>, scalar_prefetch = 0 : i64, scratch_operands = 1 : i64, tpu.core_type = #tpu.core_type<tc>, window_params = [{transform_indices = @transform_0, window_bounds = array<i64: 2, 16, 8>}, {transform_indices = @transform_1, window_bounds = array<i64: 2, 8, 128>}, {transform_indices = @transform_2, window_bounds = array<i64: 2, 8, 8>}, {transform_indices = @transform_3, window_bounds = array<i64: 2, 8, 1>}, {transform_indices = @transform_4, window_bounds = array<i64: 2, 8, 1>}, {pipeline_mode = #tpu.pipeline_mode<synchronous>, transform_indices = @transform_5, window_bounds = array<i64: 128, 256>}, {pipeline_mode = #tpu.pipeline_mode<synchronous>, transform_indices = @transform_6, window_bounds = array<i64: 1, 256>}, {pipeline_mode = #tpu.pipeline_mode<synchronous>, transform_indices = @transform_7, window_bounds = array<i64: 384, 512>}, {pipeline_mode = #tpu.pipeline_mode<synchronous>, transform_indices = @transform_8, window_bounds = array<i64: 1, 512>}, {pipeline_mode = #tpu.pipeline_mode<synchronous>, transform_indices = @transform_9, window_bounds = array<i64: 128, 256>}, {pipeline_mode = #tpu.pipeline_mode<synchronous>, transform_indices = @transform_10, window_bounds = array<i64: 1, 256>}, {pipeline_mode = #tpu.pipeline_mode<synchronous>, transform_indices = @transform_11, window_bounds = array<i64: 1, 128>}, {pipeline_mode = #tpu.pipeline_mode<synchronous>, transform_indices = @transform_12, window_bounds = array<i64: 256, 128>}, {pipeline_mode = #tpu.pipeline_mode<synchronous>, transform_indices = @transform_13, window_bounds = array<i64: 1, 128>}, {transform_indices = @transform_14, window_bounds = array<i64: 2, 128>}]} {
    %c0 = arith.constant 0 : index
    %c0_0 = arith.constant 0 : index
    %c0_1 = arith.constant 0 : index
    %0 = vector.load %arg1[%c0, %c0_0, %c0_1] : memref<2x16x8xf32, #tpu.memory_space<vmem>>, vector<2x16x8xf32>
    %1 = vector.extract_strided_slice %0 {offsets = [0, 0, 0], sizes = [2, 8, 8], strides = [1, 1, 1]} : vector<2x16x8xf32> to vector<2x8x8xf32>
    %2 = arith.truncf %1 : vector<2x8x8xf32> to vector<2x8x8xbf16>
    %3 = vector.extract_strided_slice %0 {offsets = [0, 8, 0], sizes = [2, 8, 8], strides = [1, 1, 1]} : vector<2x16x8xf32> to vector<2x8x8xf32>
    %4 = arith.truncf %3 : vector<2x8x8xf32> to vector<2x8x8xbf16>
    %c0_2 = arith.constant 0 : index
    %c0_3 = arith.constant 0 : index
    %c0_4 = arith.constant 0 : index
    %5 = vector.load %arg2[%c0_2, %c0_3, %c0_4] : memref<2x8x128xf32, #tpu.memory_space<vmem>>, vector<2x8x128xf32>
    %6 = vector.shape_cast %5 : vector<2x8x128xf32> to vector<16x128xf32>
    %c0_5 = arith.constant 0 : index
    %c0_6 = arith.constant 0 : index
    %7 = vector.load %arg16[%c0_5, %c0_6] : memref<16x128xf32, #tpu.memory_space<vmem>>, vector<16x128xf32>
    tpu.vector_store %arg16[%c0_5, %c0_6], %6 {strides = array<i32>} : memref<16x128xf32, #tpu.memory_space<vmem>>, vector<16x128xf32>,
    %c0_7 = arith.constant 0 : index
    %c0_8 = arith.constant 0 : index
    %8 = vector.load %arg16[%c0_7, %c0_8] : memref<16x128xf32, #tpu.memory_space<vmem>>, vector<16x128xf32>
    %9 = arith.truncf %8 : vector<16x128xf32> to vector<16x128xbf16>
    %c0_9 = arith.constant 0 : index
    %c0_10 = arith.constant 0 : index
    %10 = vector.load %arg6[%c0_9, %c0_10] : memref<128x256xbf16, #tpu.memory_space<vmem>>, vector<128x256xbf16>
    %cst = arith.constant dense<0.000000e+00> : vector<16x256xf32>
    %11 = tpu.matmul %9, %10, %cst {dimension_numbers = #tpu.dot_dimension_numbers<[1], [0], [0], [1], [0, 0, 1, 1], [], []>} : vector<16x128xbf16>, vector<128x256xbf16>, vector<16x256xf32> -> vector<16x256xf32>
    %c0_11 = arith.constant 0 : index
    %c0_12 = arith.constant 0 : index
    %12 = vector.load %arg7[%c0_11, %c0_12] : memref<1x256xf32, #tpu.memory_space<vmem>>, vector<1x256xf32>
    %13 = vector.broadcast %12 : vector<1x256xf32> to vector<16x256xf32>
    %14 = arith.addf %11, %13 : vector<16x256xf32>
    %15 = vector.shape_cast %14 : vector<16x256xf32> to vector<2x8x256xf32>
    %16 = arith.truncf %15 : vector<2x8x256xf32> to vector<2x8x256xbf16>
    %17 = vector.extract_strided_slice %16 {offsets = [0, 0, 0], sizes = [2, 8, 128], strides = [1, 1, 1]} : vector<2x8x256xbf16> to vector<2x8x128xbf16>
    "tpu.trace_start"() <{level = 10 : i32, message = "bql,ble->bqe"}> : () -> ()
    %cst_13 = arith.constant dense<0.000000e+00> : vector<2x8x128xf32>
    %18 = tpu.matmul %2, %17, %cst_13 {dimension_numbers = #tpu.dot_dimension_numbers<[2], [1], [1], [2], [0, 0, 0, 1, 1, 2], [0], [0]>} : vector<2x8x8xbf16>, vector<2x8x128xbf16>, vector<2x8x128xf32> -> vector<2x8x128xf32>
    "tpu.trace_stop"() : () -> ()
    %19 = vector.shape_cast %18 : vector<2x8x128xf32> to vector<16x128xf32>
    %20 = vector.extract_strided_slice %16 {offsets = [0, 0, 128], sizes = [2, 8, 128], strides = [1, 1, 1]} : vector<2x8x256xbf16> to vector<2x8x128xbf16>
    "tpu.trace_start"() <{level = 10 : i32, message = "bql,ble->bqe"}> : () -> ()
    %cst_14 = arith.constant dense<0.000000e+00> : vector<2x8x128xf32>
    %21 = tpu.matmul %4, %20, %cst_14 {dimension_numbers = #tpu.dot_dimension_numbers<[2], [1], [1], [2], [0, 0, 0, 1, 1, 2], [0], [0]>} : vector<2x8x8xbf16>, vector<2x8x128xbf16>, vector<2x8x128xf32> -> vector<2x8x128xf32>
    "tpu.trace_stop"() : () -> ()
    %22 = vector.shape_cast %21 : vector<2x8x128xf32> to vector<16x128xf32>
    %23 = arith.truncf %19 : vector<16x128xf32> to vector<16x128xbf16>
    %24 = arith.truncf %22 : vector<16x128xf32> to vector<16x128xbf16>
    %25 = tpu.concatenate %23, %24, %9 in 1 : vector<16x128xbf16>, vector<16x128xbf16>, vector<16x128xbf16> -> vector<16x384xbf16>
    %c0_15 = arith.constant 0 : index
    %c0_16 = arith.constant 0 : index
    %26 = vector.load %arg8[%c0_15, %c0_16] : memref<384x512xbf16, #tpu.memory_space<vmem>>, vector<384x512xbf16>
    %cst_17 = arith.constant dense<0.000000e+00> : vector<16x512xf32>
    %27 = tpu.matmul %25, %26, %cst_17 {dimension_numbers = #tpu.dot_dimension_numbers<[1], [0], [0], [1], [0, 0, 1, 1], [], []>} : vector<16x384xbf16>, vector<384x512xbf16>, vector<16x512xf32> -> vector<16x512xf32>
    %c0_18 = arith.constant 0 : index
    %c0_19 = arith.constant 0 : index
    %28 = vector.load %arg9[%c0_18, %c0_19] : memref<1x512xf32, #tpu.memory_space<vmem>>, vector<1x512xf32>
    %29 = vector.broadcast %28 : vector<1x512xf32> to vector<16x512xf32>
    %30 = arith.addf %27, %29 : vector<16x512xf32>
    %31 = vector.extract_strided_slice %30 {offsets = [0, 0], sizes = [16, 128], strides = [1, 1]} : vector<16x512xf32> to vector<16x128xf32>
    %32 = arith.negf %31 : vector<16x128xf32>
    %33 = math.exp %32 : vector<16x128xf32>
    %cst_20 = arith.constant 1.000000e+00 : f32
    %34 = vector.broadcast %cst_20 : f32 to vector<16x128xf32>
    %35 = arith.addf %34, %33 : vector<16x128xf32>
    %36 = arith.divf %34, %35 : vector<16x128xf32>
    %37 = vector.extract_strided_slice %30 {offsets = [0, 128], sizes = [16, 128], strides = [1, 1]} : vector<16x512xf32> to vector<16x128xf32>
    %38 = arith.negf %37 : vector<16x128xf32>
    %39 = math.exp %38 : vector<16x128xf32>
    %cst_21 = arith.constant 1.000000e+00 : f32
    %40 = vector.broadcast %cst_21 : f32 to vector<16x128xf32>
    %41 = arith.addf %40, %39 : vector<16x128xf32>
    %42 = arith.divf %40, %41 : vector<16x128xf32>
    %43 = vector.extract_strided_slice %30 {offsets = [0, 256], sizes = [16, 128], strides = [1, 1]} : vector<16x512xf32> to vector<16x128xf32>
    %44 = vector.extract_strided_slice %30 {offsets = [0, 384], sizes = [16, 128], strides = [1, 1]} : vector<16x512xf32> to vector<16x128xf32>
    %45 = arith.mulf %36, %44 : vector<16x128xf32>
    %46 = arith.addf %43, %45 : vector<16x128xf32>
    %47 = math.tanh %46 : vector<16x128xf32>
    %cst_22 = arith.constant 1.000000e+00 : f32
    %48 = vector.broadcast %cst_22 : f32 to vector<16x128xf32>
    %49 = arith.subf %48, %42 : vector<16x128xf32>
    %50 = arith.mulf %49, %8 : vector<16x128xf32>
    %51 = arith.mulf %42, %47 : vector<16x128xf32>
    %52 = arith.addf %50, %51 : vector<16x128xf32>
    %c0_23 = arith.constant 0 : index
    %c0_24 = arith.constant 0 : index
    %53 = vector.load %arg16[%c0_23, %c0_24] : memref<16x128xf32, #tpu.memory_space<vmem>>, vector<16x128xf32>
    tpu.vector_store %arg16[%c0_23, %c0_24], %52 {strides = array<i32>} : memref<16x128xf32, #tpu.memory_space<vmem>>, vector<16x128xf32>,
    %c0_25 = arith.constant 0 : index
    %c0_26 = arith.constant 0 : index
    %54 = vector.load %arg16[%c0_25, %c0_26] : memref<16x128xf32, #tpu.memory_space<vmem>>, vector<16x128xf32>
    %55 = arith.truncf %54 : vector<16x128xf32> to vector<16x128xbf16>
    %c0_27 = arith.constant 0 : index
    %c0_28 = arith.constant 0 : index
    %56 = vector.load %arg6[%c0_27, %c0_28] : memref<128x256xbf16, #tpu.memory_space<vmem>>, vector<128x256xbf16>
    %cst_29 = arith.constant dense<0.000000e+00> : vector<16x256xf32>
    %57 = tpu.matmul %55, %56, %cst_29 {dimension_numbers = #tpu.dot_dimension_numbers<[1], [0], [0], [1], [0, 0, 1, 1], [], []>} : vector<16x128xbf16>, vector<128x256xbf16>, vector<16x256xf32> -> vector<16x256xf32>
    %c0_30 = arith.constant 0 : index
    %c0_31 = arith.constant 0 : index
    %58 = vector.load %arg7[%c0_30, %c0_31] : memref<1x256xf32, #tpu.memory_space<vmem>>, vector<1x256xf32>
    %59 = vector.broadcast %58 : vector<1x256xf32> to vector<16x256xf32>
    %60 = arith.addf %57, %59 : vector<16x256xf32>
    %61 = vector.shape_cast %60 : vector<16x256xf32> to vector<2x8x256xf32>
    %62 = arith.truncf %61 : vector<2x8x256xf32> to vector<2x8x256xbf16>
    %63 = vector.extract_strided_slice %62 {offsets = [0, 0, 0], sizes = [2, 8, 128], strides = [1, 1, 1]} : vector<2x8x256xbf16> to vector<2x8x128xbf16>
    "tpu.trace_start"() <{level = 10 : i32, message = "bql,ble->bqe"}> : () -> ()
    %cst_32 = arith.constant dense<0.000000e+00> : vector<2x8x128xf32>
    %64 = tpu.matmul %2, %63, %cst_32 {dimension_numbers = #tpu.dot_dimension_numbers<[2], [1], [1], [2], [0, 0, 0, 1, 1, 2], [0], [0]>} : vector<2x8x8xbf16>, vector<2x8x128xbf16>, vector<2x8x128xf32> -> vector<2x8x128xf32>
    "tpu.trace_stop"() : () -> ()
    %65 = vector.shape_cast %64 : vector<2x8x128xf32> to vector<16x128xf32>
    %66 = vector.extract_strided_slice %62 {offsets = [0, 0, 128], sizes = [2, 8, 128], strides = [1, 1, 1]} : vector<2x8x256xbf16> to vector<2x8x128xbf16>
    "tpu.trace_start"() <{level = 10 : i32, message = "bql,ble->bqe"}> : () -> ()
    %cst_33 = arith.constant dense<0.000000e+00> : vector<2x8x128xf32>
    %67 = tpu.matmul %4, %66, %cst_33 {dimension_numbers = #tpu.dot_dimension_numbers<[2], [1], [1], [2], [0, 0, 0, 1, 1, 2], [0], [0]>} : vector<2x8x8xbf16>, vector<2x8x128xbf16>, vector<2x8x128xf32> -> vector<2x8x128xf32>
    "tpu.trace_stop"() : () -> ()
    %68 = vector.shape_cast %67 : vector<2x8x128xf32> to vector<16x128xf32>
    %69 = arith.truncf %65 : vector<16x128xf32> to vector<16x128xbf16>
    %70 = arith.truncf %68 : vector<16x128xf32> to vector<16x128xbf16>
    %71 = tpu.concatenate %69, %70, %55 in 1 : vector<16x128xbf16>, vector<16x128xbf16>, vector<16x128xbf16> -> vector<16x384xbf16>
    %c0_34 = arith.constant 0 : index
    %c0_35 = arith.constant 0 : index
    %72 = vector.load %arg8[%c0_34, %c0_35] : memref<384x512xbf16, #tpu.memory_space<vmem>>, vector<384x512xbf16>
    %cst_36 = arith.constant dense<0.000000e+00> : vector<16x512xf32>
    %73 = tpu.matmul %71, %72, %cst_36 {dimension_numbers = #tpu.dot_dimension_numbers<[1], [0], [0], [1], [0, 0, 1, 1], [], []>} : vector<16x384xbf16>, vector<384x512xbf16>, vector<16x512xf32> -> vector<16x512xf32>
    %c0_37 = arith.constant 0 : index
    %c0_38 = arith.constant 0 : index
    %74 = vector.load %arg9[%c0_37, %c0_38] : memref<1x512xf32, #tpu.memory_space<vmem>>, vector<1x512xf32>
    %75 = vector.broadcast %74 : vector<1x512xf32> to vector<16x512xf32>
    %76 = arith.addf %73, %75 : vector<16x512xf32>
    %77 = vector.extract_strided_slice %76 {offsets = [0, 0], sizes = [16, 128], strides = [1, 1]} : vector<16x512xf32> to vector<16x128xf32>
    %78 = arith.negf %77 : vector<16x128xf32>
    %79 = math.exp %78 : vector<16x128xf32>
    %cst_39 = arith.constant 1.000000e+00 : f32
    %80 = vector.broadcast %cst_39 : f32 to vector<16x128xf32>
    %81 = arith.addf %80, %79 : vector<16x128xf32>
    %82 = arith.divf %80, %81 : vector<16x128xf32>
    %83 = vector.extract_strided_slice %76 {offsets = [0, 128], sizes = [16, 128], strides = [1, 1]} : vector<16x512xf32> to vector<16x128xf32>
    %84 = arith.negf %83 : vector<16x128xf32>
    %85 = math.exp %84 : vector<16x128xf32>
    %cst_40 = arith.constant 1.000000e+00 : f32
    %86 = vector.broadcast %cst_40 : f32 to vector<16x128xf32>
    %87 = arith.addf %86, %85 : vector<16x128xf32>
    %88 = arith.divf %86, %87 : vector<16x128xf32>
    %89 = vector.extract_strided_slice %76 {offsets = [0, 256], sizes = [16, 128], strides = [1, 1]} : vector<16x512xf32> to vector<16x128xf32>
    %90 = vector.extract_strided_slice %76 {offsets = [0, 384], sizes = [16, 128], strides = [1, 1]} : vector<16x512xf32> to vector<16x128xf32>
    %91 = arith.mulf %82, %90 : vector<16x128xf32>
    %92 = arith.addf %89, %91 : vector<16x128xf32>
    %93 = math.tanh %92 : vector<16x128xf32>
    %cst_41 = arith.constant 1.000000e+00 : f32
    %94 = vector.broadcast %cst_41 : f32 to vector<16x128xf32>
    %95 = arith.subf %94, %88 : vector<16x128xf32>
    %96 = arith.mulf %95, %54 : vector<16x128xf32>
    %97 = arith.mulf %88, %93 : vector<16x128xf32>
    %98 = arith.addf %96, %97 : vector<16x128xf32>
    %c0_42 = arith.constant 0 : index
    %c0_43 = arith.constant 0 : index
    %99 = vector.load %arg16[%c0_42, %c0_43] : memref<16x128xf32, #tpu.memory_space<vmem>>, vector<16x128xf32>
    tpu.vector_store %arg16[%c0_42, %c0_43], %98 {strides = array<i32>} : memref<16x128xf32, #tpu.memory_space<vmem>>, vector<16x128xf32>,
    %c0_44 = arith.constant 0 : index
    %c0_45 = arith.constant 0 : index
    %100 = vector.load %arg16[%c0_44, %c0_45] : memref<16x128xf32, #tpu.memory_space<vmem>>, vector<16x128xf32>
    %101 = vector.shape_cast %100 : vector<16x128xf32> to vector<2x8x128xf32>
    %c0_46 = arith.constant 0 : index
    %c0_47 = arith.constant 0 : index
    %c0_48 = arith.constant 0 : index
    %102 = vector.load %arg3[%c0_46, %c0_47, %c0_48] : memref<2x8x8xf32, #tpu.memory_space<vmem>>, vector<2x8x8xf32>
    %c0_49 = arith.constant 0 : index
    %c0_50 = arith.constant 0 : index
    %c0_51 = arith.constant 0 : index
    %103 = vector.load %arg4[%c0_49, %c0_50, %c0_51] : memref<2x8x1xf32, #tpu.memory_space<vmem>>, vector<2x8x1xf32>
    %cst_52 = arith.constant 0.000000e+00 : f32
    %104 = vector.broadcast %cst_52 : f32 to vector<2x8x128xf32>
    %105 = vector.extract_strided_slice %102 {offsets = [0, 0, 0], sizes = [2, 8, 1], strides = [1, 1, 1]} : vector<2x8x8xf32> to vector<2x8x1xf32>
    %106 = vector.extract_strided_slice %101 {offsets = [0, 0, 0], sizes = [2, 1, 128], strides = [1, 1, 1]} : vector<2x8x128xf32> to vector<2x1x128xf32>
    %107 = vector.broadcast %105 : vector<2x8x1xf32> to vector<2x8x128xf32>
    %108 = vector.broadcast %106 : vector<2x1x128xf32> to vector<2x8x128xf32>
    %109 = arith.mulf %107, %108 : vector<2x8x128xf32>
    %110 = arith.addf %104, %109 : vector<2x8x128xf32>
    %111 = vector.extract_strided_slice %102 {offsets = [0, 0, 1], sizes = [2, 8, 1], strides = [1, 1, 1]} : vector<2x8x8xf32> to vector<2x8x1xf32>
    %112 = vector.extract_strided_slice %101 {offsets = [0, 1, 0], sizes = [2, 1, 128], strides = [1, 1, 1]} : vector<2x8x128xf32> to vector<2x1x128xf32>
    %113 = vector.broadcast %111 : vector<2x8x1xf32> to vector<2x8x128xf32>
    %114 = vector.broadcast %112 : vector<2x1x128xf32> to vector<2x8x128xf32>
    %115 = arith.mulf %113, %114 : vector<2x8x128xf32>
    %116 = arith.addf %110, %115 : vector<2x8x128xf32>
    %117 = vector.extract_strided_slice %102 {offsets = [0, 0, 2], sizes = [2, 8, 1], strides = [1, 1, 1]} : vector<2x8x8xf32> to vector<2x8x1xf32>
    %118 = vector.extract_strided_slice %101 {offsets = [0, 2, 0], sizes = [2, 1, 128], strides = [1, 1, 1]} : vector<2x8x128xf32> to vector<2x1x128xf32>
    %119 = vector.broadcast %117 : vector<2x8x1xf32> to vector<2x8x128xf32>
    %120 = vector.broadcast %118 : vector<2x1x128xf32> to vector<2x8x128xf32>
    %121 = arith.mulf %119, %120 : vector<2x8x128xf32>
    %122 = arith.addf %116, %121 : vector<2x8x128xf32>
    %123 = vector.extract_strided_slice %102 {offsets = [0, 0, 3], sizes = [2, 8, 1], strides = [1, 1, 1]} : vector<2x8x8xf32> to vector<2x8x1xf32>
    %124 = vector.extract_strided_slice %101 {offsets = [0, 3, 0], sizes = [2, 1, 128], strides = [1, 1, 1]} : vector<2x8x128xf32> to vector<2x1x128xf32>
    %125 = vector.broadcast %123 : vector<2x8x1xf32> to vector<2x8x128xf32>
    %126 = vector.broadcast %124 : vector<2x1x128xf32> to vector<2x8x128xf32>
    %127 = arith.mulf %125, %126 : vector<2x8x128xf32>
    %128 = arith.addf %122, %127 : vector<2x8x128xf32>
    %129 = vector.extract_strided_slice %102 {offsets = [0, 0, 4], sizes = [2, 8, 1], strides = [1, 1, 1]} : vector<2x8x8xf32> to vector<2x8x1xf32>
    %130 = vector.extract_strided_slice %101 {offsets = [0, 4, 0], sizes = [2, 1, 128], strides = [1, 1, 1]} : vector<2x8x128xf32> to vector<2x1x128xf32>
    %131 = vector.broadcast %129 : vector<2x8x1xf32> to vector<2x8x128xf32>
    %132 = vector.broadcast %130 : vector<2x1x128xf32> to vector<2x8x128xf32>
    %133 = arith.mulf %131, %132 : vector<2x8x128xf32>
    %134 = arith.addf %128, %133 : vector<2x8x128xf32>
    %135 = vector.extract_strided_slice %102 {offsets = [0, 0, 5], sizes = [2, 8, 1], strides = [1, 1, 1]} : vector<2x8x8xf32> to vector<2x8x1xf32>
    %136 = vector.extract_strided_slice %101 {offsets = [0, 5, 0], sizes = [2, 1, 128], strides = [1, 1, 1]} : vector<2x8x128xf32> to vector<2x1x128xf32>
    %137 = vector.broadcast %135 : vector<2x8x1xf32> to vector<2x8x128xf32>
    %138 = vector.broadcast %136 : vector<2x1x128xf32> to vector<2x8x128xf32>
    %139 = arith.mulf %137, %138 : vector<2x8x128xf32>
    %140 = arith.addf %134, %139 : vector<2x8x128xf32>
    %141 = vector.extract_strided_slice %102 {offsets = [0, 0, 6], sizes = [2, 8, 1], strides = [1, 1, 1]} : vector<2x8x8xf32> to vector<2x8x1xf32>
    %142 = vector.extract_strided_slice %101 {offsets = [0, 6, 0], sizes = [2, 1, 128], strides = [1, 1, 1]} : vector<2x8x128xf32> to vector<2x1x128xf32>
    %143 = vector.broadcast %141 : vector<2x8x1xf32> to vector<2x8x128xf32>
    %144 = vector.broadcast %142 : vector<2x1x128xf32> to vector<2x8x128xf32>
    %145 = arith.mulf %143, %144 : vector<2x8x128xf32>
    %146 = arith.addf %140, %145 : vector<2x8x128xf32>
    %147 = vector.extract_strided_slice %102 {offsets = [0, 0, 7], sizes = [2, 8, 1], strides = [1, 1, 1]} : vector<2x8x8xf32> to vector<2x8x1xf32>
    %148 = vector.extract_strided_slice %101 {offsets = [0, 7, 0], sizes = [2, 1, 128], strides = [1, 1, 1]} : vector<2x8x128xf32> to vector<2x1x128xf32>
    %149 = vector.broadcast %147 : vector<2x8x1xf32> to vector<2x8x128xf32>
    %150 = vector.broadcast %148 : vector<2x1x128xf32> to vector<2x8x128xf32>
    %151 = arith.mulf %149, %150 : vector<2x8x128xf32>
    %152 = arith.addf %146, %151 : vector<2x8x128xf32>
    %153 = vector.broadcast %103 : vector<2x8x1xf32> to vector<2x8x128xf32>
    %154 = arith.mulf %153, %152 : vector<2x8x128xf32>
    %cst_53 = arith.constant dense<0.000000e+00> : vector<2x128xf32>
    %155 = vector.multi_reduction <add>, %154, %cst_53 [1] : vector<2x8x128xf32> to vector<2x128xf32>
    %156 = vector.shape_cast %152 : vector<2x8x128xf32> to vector<16x128xf32>
    %157 = arith.truncf %156 : vector<16x128xf32> to vector<16x128xbf16>
    %c0_54 = arith.constant 0 : index
    %c0_55 = arith.constant 0 : index
    %158 = vector.load %arg10[%c0_54, %c0_55] : memref<128x256xbf16, #tpu.memory_space<vmem>>, vector<128x256xbf16>
    %cst_56 = arith.constant dense<0.000000e+00> : vector<16x256xf32>
    %159 = tpu.matmul %157, %158, %cst_56 {dimension_numbers = #tpu.dot_dimension_numbers<[1], [0], [0], [1], [0, 0, 1, 1], [], []>} : vector<16x128xbf16>, vector<128x256xbf16>, vector<16x256xf32> -> vector<16x256xf32>
    %c0_57 = arith.constant 0 : index
    %c0_58 = arith.constant 0 : index
    %160 = vector.load %arg11[%c0_57, %c0_58] : memref<1x256xf32, #tpu.memory_space<vmem>>, vector<1x256xf32>
    %161 = vector.broadcast %160 : vector<1x256xf32> to vector<16x256xf32>
    %162 = arith.addf %159, %161 : vector<16x256xf32>
    %163 = vector.shape_cast %162 : vector<16x256xf32> to vector<2x8x256xf32>
    %164 = vector.extract_strided_slice %163 {offsets = [0, 0, 0], sizes = [2, 8, 128], strides = [1, 1, 1]} : vector<2x8x256xf32> to vector<2x8x128xf32>
    %165 = vector.extract_strided_slice %163 {offsets = [0, 0, 128], sizes = [2, 8, 128], strides = [1, 1, 1]} : vector<2x8x256xf32> to vector<2x8x128xf32>
    %166 = vector.broadcast %103 : vector<2x8x1xf32> to vector<2x8x128xf32>
    %167 = arith.mulf %166, %165 : vector<2x8x128xf32>
    %cst_59 = arith.constant dense<0.000000e+00> : vector<2x128xf32>
    %168 = vector.multi_reduction <add>, %167, %cst_59 [1] : vector<2x8x128xf32> to vector<2x128xf32>
    %169 = vector.shape_cast %168 : vector<2x128xf32> to vector<2x1x128xf32>
    %170 = vector.broadcast %169 : vector<2x1x128xf32> to vector<2x8x128xf32>
    %171 = arith.addf %170, %164 : vector<2x8x128xf32>
    %172 = arith.negf %171 : vector<2x8x128xf32>
    %173 = math.exp %172 : vector<2x8x128xf32>
    %cst_60 = arith.constant 1.000000e+00 : f32
    %174 = vector.broadcast %cst_60 : f32 to vector<2x8x128xf32>
    %175 = arith.addf %174, %173 : vector<2x8x128xf32>
    %176 = arith.divf %174, %175 : vector<2x8x128xf32>
    %c0_61 = arith.constant 0 : index
    %c0_62 = arith.constant 0 : index
    %177 = vector.load %arg12[%c0_61, %c0_62] : memref<1x128xf32, #tpu.memory_space<vmem>>, vector<1x128xf32>
    %178 = vector.shape_cast %177 : vector<1x128xf32> to vector<1x1x128xf32>
    %179 = vector.broadcast %178 : vector<1x1x128xf32> to vector<2x8x128xf32>
    %180 = arith.mulf %176, %179 : vector<2x8x128xf32>
    %cst_63 = arith.constant dense<0.000000e+00> : vector<2x8xf32>
    %181 = vector.multi_reduction <add>, %180, %cst_63 [2] : vector<2x8x128xf32> to vector<2x8xf32>
    %182 = vector.shape_cast %181 : vector<2x8xf32> to vector<2x8x1xf32>
    %183 = vector.broadcast %182 : vector<2x8x1xf32> to vector<2x8x128xf32>
    %184 = arith.mulf %183, %152 : vector<2x8x128xf32>
    %c0_64 = arith.constant 0 : index
    %c0_65 = arith.constant 0 : index
    %c0_66 = arith.constant 0 : index
    %185 = vector.load %arg5[%c0_64, %c0_65, %c0_66] : memref<2x8x1xf32, #tpu.memory_space<vmem>>, vector<2x8x1xf32>
    %186 = vector.broadcast %185 : vector<2x8x1xf32> to vector<2x8x128xf32>
    %187 = arith.mulf %184, %186 : vector<2x8x128xf32>
    %cst_67 = arith.constant dense<0.000000e+00> : vector<2x128xf32>
    %188 = vector.multi_reduction <add>, %187, %cst_67 [1] : vector<2x8x128xf32> to vector<2x128xf32>
    %189 = tpu.concatenate %188, %155 in 1 : vector<2x128xf32>, vector<2x128xf32> -> vector<2x256xf32>
    %190 = arith.truncf %189 : vector<2x256xf32> to vector<2x256xbf16>
    %c0_68 = arith.constant 0 : index
    %c0_69 = arith.constant 0 : index
    %191 = vector.load %arg13[%c0_68, %c0_69] : memref<256x128xbf16, #tpu.memory_space<vmem>>, vector<256x128xbf16>
    %cst_70 = arith.constant dense<0.000000e+00> : vector<2x128xf32>
    %192 = tpu.matmul %190, %191, %cst_70 {dimension_numbers = #tpu.dot_dimension_numbers<[1], [0], [0], [1], [0, 0, 1, 1], [], []>} : vector<2x256xbf16>, vector<256x128xbf16>, vector<2x128xf32> -> vector<2x128xf32>
    %c0_71 = arith.constant 0 : index
    %c0_72 = arith.constant 0 : index
    %193 = vector.load %arg14[%c0_71, %c0_72] : memref<1x128xf32, #tpu.memory_space<vmem>>, vector<1x128xf32>
    %194 = vector.broadcast %193 : vector<1x128xf32> to vector<2x128xf32>
    %195 = arith.addf %192, %194 : vector<2x128xf32>
    %c0_73 = arith.constant 0 : index
    %c0_74 = arith.constant 0 : index
    %196 = vector.load %arg15[%c0_73, %c0_74] : memref<2x128xf32, #tpu.memory_space<vmem>>, vector<2x128xf32>
    tpu.vector_store %arg15[%c0_73, %c0_74], %195 {strides = array<i32>} : memref<2x128xf32, #tpu.memory_space<vmem>>, vector<2x128xf32>,
    return
  }
  func.func @transform_0(%arg0: i32) -> (i32, i32, i32) {
    %c0_i32 = arith.constant 0 : i32
    %c0_i32_0 = arith.constant 0 : i32
    %c0_i32_1 = arith.constant 0 : i32
    return %arg0, %c0_i32, %c0_i32_0 : i32, i32, i32
  }
  func.func @transform_1(%arg0: i32) -> (i32, i32, i32) {
    %c0_i32 = arith.constant 0 : i32
    %c0_i32_0 = arith.constant 0 : i32
    %c0_i32_1 = arith.constant 0 : i32
    return %arg0, %c0_i32, %c0_i32_0 : i32, i32, i32
  }
  func.func @transform_2(%arg0: i32) -> (i32, i32, i32) {
    %c0_i32 = arith.constant 0 : i32
    %c0_i32_0 = arith.constant 0 : i32
    %c0_i32_1 = arith.constant 0 : i32
    return %arg0, %c0_i32, %c0_i32_0 : i32, i32, i32
  }
  func.func @transform_3(%arg0: i32) -> (i32, i32, i32) {
    %c0_i32 = arith.constant 0 : i32
    %c0_i32_0 = arith.constant 0 : i32
    %c0_i32_1 = arith.constant 0 : i32
    return %arg0, %c0_i32, %c0_i32_0 : i32, i32, i32
  }
  func.func @transform_4(%arg0: i32) -> (i32, i32, i32) {
    %c0_i32 = arith.constant 0 : i32
    %c0_i32_0 = arith.constant 0 : i32
    %c0_i32_1 = arith.constant 0 : i32
    return %arg0, %c0_i32, %c0_i32_0 : i32, i32, i32
  }
  func.func @transform_5(%arg0: i32) -> (i32, i32) {
    %c0_i32 = arith.constant 0 : i32
    %c0_i32_0 = arith.constant 0 : i32
    %c0_i32_1 = arith.constant 0 : i32
    return %c0_i32, %c0_i32_0 : i32, i32
  }
  func.func @transform_6(%arg0: i32) -> (i32, i32) {
    %c0_i32 = arith.constant 0 : i32
    %c0_i32_0 = arith.constant 0 : i32
    %c0_i32_1 = arith.constant 0 : i32
    return %c0_i32, %c0_i32_0 : i32, i32
  }
  func.func @transform_7(%arg0: i32) -> (i32, i32) {
    %c0_i32 = arith.constant 0 : i32
    %c0_i32_0 = arith.constant 0 : i32
    %c0_i32_1 = arith.constant 0 : i32
    return %c0_i32, %c0_i32_0 : i32, i32
  }
  func.func @transform_8(%arg0: i32) -> (i32, i32) {
    %c0_i32 = arith.constant 0 : i32
    %c0_i32_0 = arith.constant 0 : i32
    %c0_i32_1 = arith.constant 0 : i32
    return %c0_i32, %c0_i32_0 : i32, i32
  }
  func.func @transform_9(%arg0: i32) -> (i32, i32) {
    %c0_i32 = arith.constant 0 : i32
    %c0_i32_0 = arith.constant 0 : i32
    %c0_i32_1 = arith.constant 0 : i32
    return %c0_i32, %c0_i32_0 : i32, i32
  }
  func.func @transform_10(%arg0: i32) -> (i32, i32) {
    %c0_i32 = arith.constant 0 : i32
    %c0_i32_0 = arith.constant 0 : i32
    %c0_i32_1 = arith.constant 0 : i32
    return %c0_i32, %c0_i32_0 : i32, i32
  }
  func.func @transform_11(%arg0: i32) -> (i32, i32) {
    %c0_i32 = arith.constant 0 : i32
    %c0_i32_0 = arith.constant 0 : i32
    %c0_i32_1 = arith.constant 0 : i32
    return %c0_i32, %c0_i32_0 : i32, i32
  }
  func.func @transform_12(%arg0: i32) -> (i32, i32) {
    %c0_i32 = arith.constant 0 : i32
    %c0_i32_0 = arith.constant 0 : i32
    %c0_i32_1 = arith.constant 0 : i32
    return %c0_i32, %c0_i32_0 : i32, i32
  }
  func.func @transform_13(%arg0: i32) -> (i32, i32) {
    %c0_i32 = arith.constant 0 : i32
    %c0_i32_0 = arith.constant 0 : i32
    %c0_i32_1 = arith.constant 0 : i32
    return %c0_i32, %c0_i32_0 : i32, i32
  }
  func.func @transform_14(%arg0: i32) -> (i32, i32) {
    %c0_i32 = arith.constant 0 : i32
    %c0_i32_0 = arith.constant 0 : i32
    return %arg0, %c0_i32 : i32, i32
  }
}

</mosaic_0001>

<bundles_post_ra>
// kernel: tpu_custom_call.1
= control target key start
LH: loop header
LB: loop body
LE: loop exit
PB: predicated region body
PF: predicated region fallthrough
CT: control target
= control target key end

     0   :  { %19 = vsyncpa [#allocation4], 0  ;;  %s4883_s0 = inlined_call_operand.vmem [shape: f32[2,16,8], index: 0, kind: input, shape index: {}]   ;;  %s4884_s1 = inlined_call_operand.hbm [shape: f32[2,8,128], index: 1, kind: input, shape index: {}]   ;;  %s4885_s2 = inlined_call_operand.hbm [shape: f32[2,8,8], index: 2, kind: input, shape index: {}]   ;;  %s4886_s3 = inlined_call_operand.vmem [shape: f32[2,8,1], index: 3, kind: input, shape index: {}]   ;;  %s4887_s4 = inlined_call_operand.vmem [shape: f32[2,8,1], index: 4, kind: input, shape index: {}]   ;;  %s4888_s5 = inlined_call_operand.hbm [shape: bf16[128,256], index: 5, kind: input, shape index: {}]   ;;  %s4889_s6 = inlined_call_operand.hbm [shape: f32[1,256], index: 6, kind: input, shape index: {}]   ;;  %s4890_s7 = inlined_call_operand.hbm [shape: bf16[384,512], index: 7, kind: input, shape index: {}]   ;;  %s4891_s8 = inlined_call_operand.hbm [shape: f32[1,512], index: 8, kind: input, shape index: {}]   ;;  %s4892_s9 = inlined_call_operand.hbm [shape: bf16[128,256], index: 9, kind: input, shape index: {}]   ;;  %s4893_s10 = inlined_call_operand.hbm [shape: f32[1,256], index: 10, kind: input, shape index: {}]   ;;  %s4894_s11 = inlined_call_operand.vmem [shape: f32[1,128], index: 11, kind: input, shape index: {}]   ;;  %s4895_s12 = inlined_call_operand.vmem [shape: bf16[256,128], index: 12, kind: input, shape index: {}]   ;;  %s4896_s13 = inlined_call_operand.vmem [shape: f32[1,128], index: 13, kind: input, shape index: {}]   ;;  %s4897_s14 = inlined_call_operand.hbm [shape: f32[2,128], index: 14, kind: output, shape index: {}]  }
   0x1   :  { %20 = vsyncpa [#allocation7], 0 }
   0x2   :  { %21 = vsyncpa [#allocation10], 0 }
   0x3   :  { %22 = vsyncpa [#allocation13], 0 }
   0x4   :  { %23 = vsyncpa [#allocation16], 0 }
   0x5   :  { %24 = vsyncpa [#allocation5], 0  ;;  %s3978_s29 = smov [#allocation6]   ;;  %s3979_s15 = smov [#allocation9]  }
   0x6   :  { %s44_s30 = sshll.u32 %s3978_s29, 4  ;;  %s73_s16 = sshll.u32 %s3979_s15, 4  ;;  %s45_s30 = int_to_ptr.vmem [resolvable:$true] %s44_s30  ;;  %s74_s16 = int_to_ptr.vmem [resolvable:$true] %s73_s16 }
   0x7   :  { %s3768_s19 = scalar_lea.hbm %s4885_s2, 256 }
   0x8   :  { %p3769_p0 = scmp.ne.s32.totalorder %s4885_s2, %s3768_s19  ;;  %p3772_p1 = scmp.lt.u32.totalorder %s3768_s19, %s4885_s2 }
   0xa   :  { %p3774_p2 = pnand %p3772_p1, %p3769_p0 }
   0xc   :  { %3777 = shalt.err (!%p3774_p2)
}
   0xd   :  { %s3778_s24 = scalar_lea.vmem %s45_s30, 256  ;;  %p3783_p4 = scmp.lt.s32.totalorder %s45_s30, %s45_s30 }
   0xe   :  { %p3779_p3 = scmp.ne.s32.totalorder %s45_s30, %s3778_s24  ;;  %p3784_p5 = scmp.lt.s32.totalorder %s3778_s24, %s3778_s24 }
  0x10   :  { %p3785_p6 = por %p3784_p5, %p3783_p4 }
  0x12   :  { %p3786_p7 = pnand %p3785_p6, %p3779_p3 }
  0x14   :  { %3789 = shalt.err (!%p3786_p7)
}
  0x15   :  { %s3980_s25 = smov 128   ;;  %s3981_s26 = smov 8  }
  0x16   :  { %50 = dma.hbm_to_vmem [thread:$0]  %s4885_s2, 256, %s45_s30, [#allocation7], %s3980_s25, %s3980_s25, %s3981_s26  }
  0x17   :  { %s3790_s17 = scalar_lea.hbm %s4889_s6, 32 }
  0x18   :  { %p3791_p8 = scmp.ne.s32.totalorder %s4889_s6, %s3790_s17  ;;  %p3794_p9 = scmp.lt.u32.totalorder %s3790_s17, %s4889_s6 }
  0x1a   :  { %p3796_p10 = pnand %p3794_p9, %p3791_p8 }
  0x1c   :  { %3799 = shalt.err (!%p3796_p10)
}
  0x1d   :  { %s3800_s22 = scalar_lea.vmem %s74_s16, 32  ;;  %p3805_p12 = scmp.lt.s32.totalorder %s74_s16, %s74_s16 }
  0x1e   :  { %p3801_p11 = scmp.ne.s32.totalorder %s74_s16, %s3800_s22  ;;  %p3806_p13 = scmp.lt.s32.totalorder %s3800_s22, %s3800_s22 }
  0x20   :  { %p3807_p0 = por %p3806_p13, %p3805_p12 }
  0x22   :  { %p3808_p1 = pnand %p3807_p0, %p3801_p11 }
  0x24   :  { %3811 = shalt.err (!%p3808_p1)
}
  0x25   :  { %76 = dma.hbm_to_vmem [thread:$0]  %s4889_s6, 32, %s74_s16, [#allocation10]  }
  0x26   :  { %s3982_s23 = smov [#allocation12]   ;;  %s3983_s27 = smov [#allocation3]  }
  0x27   :  { %s95_s24 = sshll.u32 %s3982_s23, 4  ;;  %s32_s28 = sshll.u32 %s3983_s27, 4  ;;  %s96_s24 = int_to_ptr.vmem [resolvable:$true] %s95_s24  ;;  %s4103_s28 = int_to_ptr.vmem [resolvable:$true] %s32_s28 }
  0x28   :  { %s3812_s17 = scalar_lea.hbm %s4891_s8, 64 }
  0x29   :  { %p3813_p2 = scmp.ne.s32.totalorder %s4891_s8, %s3812_s17  ;;  %p3816_p3 = scmp.lt.u32.totalorder %s3812_s17, %s4891_s8 }
  0x2b   :  { %p3818_p4 = pnand %p3816_p3, %p3813_p2 }
  0x2d   :  { %3821 = shalt.err (!%p3818_p4)
}
  0x2e   :  { %s3822_s6 = scalar_lea.vmem %s96_s24, 64  ;;  %p3827_p6 = scmp.lt.s32.totalorder %s96_s24, %s96_s24 }
  0x2f   :  { %p3823_p5 = scmp.ne.s32.totalorder %s96_s24, %s3822_s6  ;;  %p3828_p7 = scmp.lt.s32.totalorder %s3822_s6, %s3822_s6 }
  0x31   :  { %p3829_p8 = por %p3828_p7, %p3827_p6 }
  0x33   :  { %p3830_p9 = pnand %p3829_p8, %p3823_p5 }
  0x35   :  { %3833 = shalt.err (!%p3830_p9)
}
  0x36   :  { %98 = dma.hbm_to_vmem [thread:$0]  %s4891_s8, 64, %s96_s24, [#allocation13]  }
  0x37   :  { %s3834_s23 = scalar_lea.hbm %s4884_s1, 256 }
  0x38   :  { %p3835_p10 = scmp.ne.s32.totalorder %s4884_s1, %s3834_s23  ;;  %p3838_p11 = scmp.lt.u32.totalorder %s3834_s23, %s4884_s1 }
  0x3a   :  { %p3840_p12 = pnand %p3838_p11, %p3835_p10 }
  0x3c   :  { %3843 = shalt.err (!%p3840_p12)
}
  0x3d   :  { %s3844_s18 = scalar_lea.vmem %s4103_s28, 256  ;;  %p3849_p0 = scmp.lt.s32.totalorder %s4103_s28, %s4103_s28 }
  0x3e   :  { %p3845_p13 = scmp.ne.s32.totalorder %s4103_s28, %s3844_s18  ;;  %p3850_p1 = scmp.lt.s32.totalorder %s3844_s18, %s3844_s18 }
  0x40   :  { %p3851_p2 = por %p3850_p1, %p3849_p0 }
  0x42   :  { %p3852_p3 = pnand %p3851_p2, %p3845_p13 }
  0x44   :  { %3855 = shalt.err (!%p3852_p3)
}
  0x45   :  { %38 = dma.hbm_to_vmem [thread:$0]  %s4884_s1, 256, %s4103_s28, [#allocation4], %s3980_s25, %s3980_s25, %s3981_s26  }
  0x46   :  { %s3984_s19 = smov [#allocation8]   ;;  %s3985_s21 = smov [#allocation11]  }
  0x47   :  { %s60_s20 = sshll.u32 %s3984_s19, 4  ;;  %s82_s6 = sshll.u32 %s3985_s21, 4  ;;  %s61_s20 = int_to_ptr.vmem [resolvable:$true] %s60_s20  ;;  %s4137_s6 = int_to_ptr.vmem [resolvable:$true] %s82_s6 }
  0x48   :  { %s3856_s2 = scalar_lea.hbm %s4888_s5, 2048 }
  0x49   :  { %p3857_p4 = scmp.ne.s32.totalorder %s4888_s5, %s3856_s2  ;;  %p3860_p5 = scmp.lt.u32.totalorder %s3856_s2, %s4888_s5 }
  0x4b   :  { %p3862_p6 = pnand %p3860_p5, %p3857_p4 }
  0x4d   :  { %3865 = shalt.err (!%p3862_p6)
}
  0x4e   :  { %s3866_s1 = scalar_lea.vmem %s61_s20, 2048  ;;  %p3871_p8 = scmp.lt.s32.totalorder %s61_s20, %s61_s20 }
  0x4f   :  { %p3867_p7 = scmp.ne.s32.totalorder %s61_s20, %s3866_s1  ;;  %p3872_p9 = scmp.lt.s32.totalorder %s3866_s1, %s3866_s1 }
  0x51   :  { %p3873_p10 = por %p3872_p9, %p3871_p8 }
  0x53   :  { %p3874_p11 = pnand %p3873_p10, %p3867_p7 }
  0x55   :  { %3877 = shalt.err (!%p3874_p11)
}
  0x56   :  { %66 = dma.hbm_to_vmem [thread:$0]  %s4888_s5, 2048, %s61_s20, [#allocation7], %s3980_s25, %s3980_s25, %s3981_s26  }
  0x57   :  { %s3878_s8 = scalar_lea.hbm %s4890_s7, 12288 }
  0x58   :  { %p3879_p12 = scmp.ne.s32.totalorder %s4890_s7, %s3878_s8  ;;  %p3882_p13 = scmp.lt.u32.totalorder %s3878_s8, %s4890_s7 }
  0x5a   :  { %p3884_p0 = pnand %p3882_p13, %p3879_p12 }
  0x5c   :  { %3887 = shalt.err (!%p3884_p0)
}
  0x5d   :  { %s3888_s22 = scalar_lea.vmem %s4137_s6, 12288  ;;  %p3893_p2 = scmp.lt.s32.totalorder %s4137_s6, %s4137_s6 }
  0x5e   :  { %p3889_p1 = scmp.ne.s32.totalorder %s4137_s6, %s3888_s22  ;;  %p3894_p3 = scmp.lt.s32.totalorder %s3888_s22, %s3888_s22 }
  0x60   :  { %p3895_p4 = por %p3894_p3, %p3893_p2 }
  0x62   :  { %p3896_p5 = pnand %p3895_p4, %p3889_p1 }
  0x64   :  { %3899 = shalt.err (!%p3896_p5)
}
  0x65   :  { %s3986_s5 = smov 256   ;;  %s3987_s20 = smov 16  }
  0x66   :  { %88 = dma.hbm_to_vmem [thread:$0]  %s4890_s7, 12288, %s4137_s6, [#allocation10], %s3986_s5, %s3986_s5, %s3987_s20  }
  0x67   :  { %s3988_s23 = smov [#allocation14]   ;;  %s3989_s29 = smov [#allocation15]  }
  0x68   :  { %s104_s27 = sshll.u32 %s3988_s23, 4  ;;  %s117_s1 = sshll.u32 %s3989_s29, 4  ;;  %s105_s27 = int_to_ptr.vmem [resolvable:$true] %s104_s27  ;;  %s118_s1 = int_to_ptr.vmem [resolvable:$true] %s117_s1 }
  0x69   :  { %s3900_s17 = scalar_lea.hbm %s4892_s9, 2048 }
  0x6a   :  { %p3901_p6 = scmp.ne.s32.totalorder %s4892_s9, %s3900_s17  ;;  %p3904_p7 = scmp.lt.u32.totalorder %s3900_s17, %s4892_s9 }
  0x6c   :  { %p3906_p8 = pnand %p3904_p7, %p3901_p6 }
  0x6e   :  { %3909 = shalt.err (!%p3906_p8)
}
  0x6f   :  { %s3910_s7 = scalar_lea.vmem %s105_s27, 2048  ;;  %p3915_p10 = scmp.lt.s32.totalorder %s105_s27, %s105_s27 }
  0x70   :  { %p3911_p9 = scmp.ne.s32.totalorder %s105_s27, %s3910_s7  ;;  %p3916_p11 = scmp.lt.s32.totalorder %s3910_s7, %s3910_s7 }
  0x72   :  { %p3917_p12 = por %p3916_p11, %p3915_p10 }
  0x74   :  { %p3918_p13 = pnand %p3917_p12, %p3911_p9 }
  0x76   :  { %3921 = shalt.err (!%p3918_p13)
}
  0x77   :  { %110 = dma.hbm_to_vmem [thread:$0]  %s4892_s9, 2048, %s105_s27, [#allocation13], %s3980_s25, %s3980_s25, %s3981_s26  }
  0x78   :  { %s3922_s5 = scalar_lea.hbm %s4893_s10, 32 }
  0x79   :  { %p3923_p0 = scmp.ne.s32.totalorder %s4893_s10, %s3922_s5  ;;  %p3926_p1 = scmp.lt.u32.totalorder %s3922_s5, %s4893_s10 }
  0x7b   :  { %p3928_p2 = pnand %p3926_p1, %p3923_p0 }
  0x7d   :  { %3931 = shalt.err (!%p3928_p2)
}
  0x7e   :  { %s3932_s29 = scalar_lea.vmem %s118_s1, 32  ;;  %p3937_p4 = scmp.lt.s32.totalorder %s118_s1, %s118_s1 }
  0x7f   :  { %p3933_p3 = scmp.ne.s32.totalorder %s118_s1, %s3932_s29  ;;  %p3938_p5 = scmp.lt.s32.totalorder %s3932_s29, %s3932_s29 }
  0x81   :  { %p3939_p6 = por %p3938_p5, %p3937_p4 }
  0x83   :  { %p3940_p7 = pnand %p3939_p6, %p3933_p3 }
  0x85   :  { %3943 = shalt.err (!%p3940_p7)
}
  0x86   :  { %120 = dma.hbm_to_vmem [thread:$0]  %s4893_s10, 32, %s118_s1, [#allocation16]  }
  0x87   :  { %3966 = dma.done.wait [#allocation4], 256  }
  0x88   :  { %3967 = vsyncadd [#allocation4], 4294967040 }
  0x89   :  { %3968 = dma.done.wait [#allocation7], 2304  }
  0x8a   :  { %3969 = vsyncadd [#allocation7], 4294964992 }
  0x8b   :  { %3970 = dma.done.wait [#allocation10], 12320  }
  0x8c   :  { %3971 = vsyncadd [#allocation10], 4294954976 }
  0x8d   :  { %3972 = dma.done.wait [#allocation13], 2112  }
  0x8e   :  { %3973 = vsyncadd [#allocation13], 4294965184 }
  0x8f   :  { %3974 = dma.done.wait [#allocation16], 32  }
  0x90   :  { %3975 = vsyncadd [#allocation16], 4294967264  ;;  %v4900_v0 = vmov 0   ;;  %v4200_v1 = vld [vmem:[#allocation8 + $0x4] ss:$8 sps:$4 sm:$0xff]   ;;  %v4898_v20 = vmov 0.0   ;;  %v185_v41 = vlaneseq }
  0x91   :  { %307 = vmatprep.mubr.bf16.mxu0 %v4900_v0  ;;  %3498 = vset.pattern.permute.xlu0 %v4900_v0  ;;  %v4202_v2 = vld [vmem:[#allocation8] ss:$8 sps:$4 sm:$0xff]   ;;  %v4205_v3 = vld [vmem:[#allocation8 + $0x14] ss:$8 sps:$4 sm:$0xff]   ;;  %v4208_v4 = vld [vmem:[#allocation8 + $0x10] ss:$8 sps:$4 sm:$0xff]  }
  0x92   :  { %275 = vmatprep.subr.bf16.mxu0 %v4200_v1  ;;  %v4211_v5 = vld [vmem:[#allocation8 + $0x24] ss:$8 sps:$4 sm:$0xff]   ;;  %v4214_v6 = vld [vmem:[#allocation8 + $0x20] ss:$8 sps:$4 sm:$0xff]   ;;  %v4217_v7 = vld [vmem:[#allocation8 + $0x34] ss:$8 sps:$4 sm:$0xff]   ;;  %3395 = vmatprep.subr.bf16.mxu1 %v4898_v20 }
  0x93   :  { %276 = vmatpush1.bf16.msra.mxu0 %v4202_v2  ;;  %v4220_v8 = vld [vmem:[#allocation8 + $0x30] ss:$8 sps:$4 sm:$0xff]   ;;  %v4222_v9 = vld [vmem:[#allocation8 + $0x44] ss:$8 sps:$4 sm:$0xff]   ;;  %v4225_v10 = vld [vmem:[#allocation8 + $0x40] ss:$8 sps:$4 sm:$0xff]  }
  0x94   :  { %277 = vmatprep.subr.bf16.mxu0 %v4205_v3  ;;  %v4227_v11 = vld [vmem:[#allocation8 + $0x54] ss:$8 sps:$4 sm:$0xff]   ;;  %v4231_v12 = vld [vmem:[#allocation8 + $0x50] ss:$8 sps:$4 sm:$0xff]   ;;  %v4233_v13 = vld [vmem:[#allocation8 + $0x64] ss:$8 sps:$4 sm:$0xff]  }
  0x95   :  { %v4237_v14 = vld [vmem:[#allocation8 + $0x60] ss:$8 sps:$4 sm:$0xff]   ;;  %v4239_v15 = vld [vmem:[#allocation8 + $0x74] ss:$8 sps:$4 sm:$0xff]   ;;  %v4243_v16 = vld [vmem:[#allocation8 + $0x70] ss:$8 sps:$4 sm:$0xff]  }
  0x96   :  { %v4245_v17 = vld [vmem:[#allocation3] sm:$0xff]  ;;  %v4247_v18 = vld [vmem:[#allocation3 + $0x8] sm:$0xff]  ;;  %vm3992_vm0 = vmmov 0   ;;  %v4320_v42 = vshrl.u32 %v185_v41, 7  ;;  %vm326_vm1 = vcmask 1043456   ;;  %vm322_vm2 = vcmask 64512  }
  0x97   :  { %278 = vmatpush1.bf16.msra.mxu0 %v4208_v4  ;;  %v4253_v19 = vpack.c.bf16 %v4247_v18, %v4245_v17  ;;  %3397 = vmatprep.mubr.msk.bf16.mxu1 %vm3992_vm0, %v4898_v20  ;;  %v4260_v21 = vld [vmem:[#allocation11 + $0x8] ss:$16 sps:$4 sm:$0xff]   ;;  %v4262_v22 = vld [vmem:[#allocation11 + $0xc] ss:$16 sps:$4 sm:$0xff]   ;;  %v4421_v0 = vld [vmem:[#allocation11 + $0x100] ss:$16 sps:$4 sm:$0xff]  }
  0x98   :  { %279 = vmatprep.subr.bf16.mxu0 %v4211_v5  ;;  %4972 = vst [vmem:[#allocation24_spill] sm:$0xff] %v4260_v21  ;;  %4973 = vst [vmem:[#allocation25_spill] sm:$0xff] %v4262_v22  ;;  %v4264_v23 = vld [vmem:[#allocation11 + $0x2c] ss:$16 sps:$4 sm:$0xff]   ;;  %v4268_v24 = vld [vmem:[#allocation11 + $0x28] ss:$16 sps:$4 sm:$0xff]  }
  0x99   :  { %4974 = vst [vmem:[#allocation26_spill] sm:$0xff] %v4264_v23  ;;  %4975 = vst [vmem:[#allocation27_spill] sm:$0xff] %v4268_v24  ;;  %v4271_v25 = vld [vmem:[#allocation11 + $0x4c] ss:$16 sps:$4 sm:$0xff]   ;;  %v4274_v26 = vld [vmem:[#allocation11 + $0x48] ss:$16 sps:$4 sm:$0xff]  }
  0x9a   :  { %4976 = vst [vmem:[#allocation28_spill] sm:$0xff] %v4271_v25  ;;  %4977 = vst [vmem:[#allocation29_spill] sm:$0xff] %v4274_v26  ;;  %v4277_v27 = vld [vmem:[#allocation11 + $0x6c] ss:$16 sps:$4 sm:$0xff]   ;;  %v4280_v28 = vld [vmem:[#allocation11 + $0x68] ss:$16 sps:$4 sm:$0xff]  }
  0x9b   :  { %280 = vmatpush1.bf16.msra.mxu0 %v4214_v6  ;;  %4978 = vst [vmem:[#allocation30_spill] sm:$0xff] %v4277_v27  ;;  %4979 = vst [vmem:[#allocation31_spill] sm:$0xff] %v4280_v28  ;;  %v4283_v29 = vld [vmem:[#allocation11 + $0x8c] ss:$16 sps:$4 sm:$0xff]   ;;  %v4286_v30 = vld [vmem:[#allocation11 + $0x88] ss:$16 sps:$4 sm:$0xff]  }
  0x9c   :  { %281 = vmatprep.subr.bf16.mxu0 %v4217_v7  ;;  %4980 = vst [vmem:[#allocation32_spill] sm:$0xff] %v4283_v29  ;;  %4981 = vst [vmem:[#allocation33_spill] sm:$0xff] %v4286_v30  ;;  %v4289_v31 = vld [vmem:[#allocation11 + $0xac] ss:$16 sps:$4 sm:$0xff]   ;;  %v4292_v32 = vld [vmem:[#allocation11 + $0xa8] ss:$16 sps:$4 sm:$0xff]  }
  0x9d   :  { %4982 = vst [vmem:[#allocation34_spill] sm:$0xff] %v4289_v31  ;;  %4983 = vst [vmem:[#allocation35_spill] sm:$0xff] %v4292_v32  ;;  %v4295_v33 = vld [vmem:[#allocation11 + $0xcc] ss:$16 sps:$4 sm:$0xff]   ;;  %v4298_v34 = vld [vmem:[#allocation11 + $0xc8] ss:$16 sps:$4 sm:$0xff]  }
  0x9e   :  { %4984 = vst [vmem:[#allocation36_spill] sm:$0xff] %v4295_v33  ;;  %4985 = vst [vmem:[#allocation37_spill] sm:$0xff] %v4298_v34  ;;  %v4301_v35 = vld [vmem:[#allocation11 + $0xec] ss:$16 sps:$4 sm:$0xff]   ;;  %v4304_v36 = vld [vmem:[#allocation11 + $0xe8] ss:$16 sps:$4 sm:$0xff]  }
  0x9f   :  { %282 = vmatpush1.bf16.msra.mxu0 %v4220_v8  ;;  %4986 = vst [vmem:[#allocation38_spill] sm:$0xff] %v4301_v35  ;;  %4987 = vst [vmem:[#allocation39_spill] sm:$0xff] %v4304_v36  ;;  %v4307_v37 = vld [vmem:[#allocation11 + $0x10c] ss:$16 sps:$4 sm:$0xff]   ;;  %v4310_v38 = vld [vmem:[#allocation11 + $0x108] ss:$16 sps:$4 sm:$0xff]  }
  0xa0   :  { %283 = vmatprep.subr.bf16.mxu0 %v4222_v9  ;;  %4988 = vst [vmem:[#allocation40_spill] sm:$0xff] %v4307_v37  ;;  %4989 = vst [vmem:[#allocation41_spill] sm:$0xff] %v4310_v38  ;;  %v4313_v39 = vld [vmem:[#allocation11 + $0x12c] ss:$16 sps:$4 sm:$0xff]   ;;  %v4316_v40 = vld [vmem:[#allocation11 + $0x128] ss:$16 sps:$4 sm:$0xff]  }
  0xa1   :  { %4990 = vst [vmem:[#allocation42_spill] sm:$0xff] %v4313_v39  ;;  %4991 = vst [vmem:[#allocation43_spill] sm:$0xff] %v4316_v40  ;;  %v4323_v43 = vsub.s32 0, %v4320_v42  ;;  %v183_v44 = vld [vmem:[#allocation9] sm:$0x3]  ;;  %v4327_v48 = vsub.s32 1, %v4320_v42 }
  0xa2   :  { %4992 = vst [vmem:[#allocation44_spill] sm:$0xff] %v4320_v42  ;;  %v152_v51 = vld [vmem:[%s4883_s0] sm:$0xff]  ;;  %v154_v61 = vld [vmem:[%s4883_s0 + $0x10] sm:$0xff]  ;;  %vm2877_vm3 = vcmask 1041409   ;;  %s4000_s29 = smov [#allocation17]  }
  0xa3   :  { %284 = vmatpush1.bf16.msra.mxu0 %v4225_v10  ;;  %v188_v45 = vrot.slane %v183_v44, %v4323_v43  ;;  %v192_v55 = vrot.slane %v183_v44, %v4327_v48  ;;  %v4334_v58 = vpack.c.bf16 %v152_v51, %v152_v51  ;;  %v4346_v63 = vpack.c.bf16 %v154_v61, %v154_v61  ;;  %v155_v51 = vld [vmem:[%s4883_s0 + $0x18] sm:$0xff]  ;;  %s3068_s9 = sshll.u32 %s4000_s29, 4  ;;  %s3069_s9 = int_to_ptr.vmem [resolvable:$true] %s3068_s9 }
  0xa4   :  { %285 = vmatprep.subr.bf16.mxu0 %v4227_v11  ;;  %v4394_v61 = vld [vmem:[#allocation11 + $0x84] ss:$16 sps:$4 sm:$0xff]   ;;  %s3944_s25 = scalar_lea.vmem %s3069_s9, 32  ;;  %p3949_p9 = scmp.lt.s32.totalorder %s3069_s9, %s3069_s9 }
  0xa5   :  { %4993 = vst [vmem:[#allocation45_spill] sm:$0xff] %v4334_v58  ;;  %4994 = vst [vmem:[#allocation46_spill] sm:$0xff] %v4346_v63  ;;  %p3945_p8 = scmp.ne.s32.totalorder %s3069_s9, %s3944_s25  ;;  %p3950_p10 = scmp.lt.s32.totalorder %s3944_s25, %s3944_s25 }
  0xa7   :  { %286 = vmatpush1.bf16.msra.mxu0 %v4231_v12  ;;  %p3951_p11 = por %p3950_p10, %p3949_p9 }
  0xa8   :  { %287 = vmatprep.subr.bf16.mxu0 %v4233_v13 }
  0xa9   :  { %p3952_p12 = pnand %p3951_p11, %p3945_p8 }
  0xab   :  { %288 = vmatpush1.bf16.msra.mxu0 %v4237_v14 }
  0xac   :  { %289 = vmatprep.subr.bf16.mxu0 %v4239_v15 }
  0xaf   :  { %290 = vmatpush1.bf16.msra.mxu0 %v4243_v16 }
  0xb0   :  { %1194 = vmatprep.subr.bf16.mxu0 %v4262_v22 }
  0xb2   :  { %308 = vmatmul.mubr.bf16.vlgmr.msra.gmra.mrb[0].mxu0 %v4253_v19 }
  0xb3   :  { %1195 = vmatpush1.bf16.msra.mxu0 %v4260_v21  ;;  %v4505_v21 = vld [vmem:[#allocation11 + $0x20c] ss:$16 sps:$4 sm:$0xff]  }
  0xb4   :  { %1196 = vmatprep.subr.bf16.mxu0 %v4264_v23  ;;  %v4491_v23 = vld [vmem:[#allocation11 + $0x1ec] ss:$16 sps:$4 sm:$0xff]   ;;  %5019 = vst [vmem:[#allocation71_spill] sm:$0xff] %v4505_v21 }
  0xb5   :  { %5015 = vst [vmem:[#allocation67_spill] sm:$0xff] %v4491_v23 }
  0xb7   :  { %1197 = vmatpush1.bf16.msra.mxu0 %v4268_v24  ;;  %v4485_v24 = vld [vmem:[#allocation11 + $0x1c8] ss:$16 sps:$4 sm:$0xff]  }
  0xb8   :  { %1198 = vmatprep.subr.bf16.mxu0 %v4271_v25  ;;  %v4483_v25 = vld [vmem:[#allocation11 + $0x1c0] ss:$16 sps:$4 sm:$0xff]   ;;  %5013 = vst [vmem:[#allocation65_spill] sm:$0xff] %v4485_v24 }
  0xb9   :  { %5012 = vst [vmem:[#allocation64_spill] sm:$0xff] %v4483_v25 }
  0xbb   :  { %1199 = vmatpush1.bf16.msra.mxu0 %v4274_v26  ;;  %v4481_v26 = vld [vmem:[#allocation11 + $0x1cc] ss:$16 sps:$4 sm:$0xff]  }
  0xbc   :  { %1200 = vmatprep.subr.bf16.mxu0 %v4277_v27  ;;  %v4467_v27 = vld [vmem:[#allocation11 + $0x1ac] ss:$16 sps:$4 sm:$0xff]   ;;  %5011 = vst [vmem:[#allocation63_spill] sm:$0xff] %v4481_v26 }
  0xbd   :  { %5007 = vst [vmem:[#allocation59_spill] sm:$0xff] %v4467_v27 }
  0xbf   :  { %1201 = vmatpush1.bf16.msra.mxu0 %v4280_v28  ;;  %v4461_v28 = vld [vmem:[#allocation11 + $0x188] ss:$16 sps:$4 sm:$0xff]  }
  0xc0   :  { %1202 = vmatprep.subr.bf16.mxu0 %v4283_v29  ;;  %v4459_v29 = vld [vmem:[#allocation11 + $0x180] ss:$16 sps:$4 sm:$0xff]   ;;  %5005 = vst [vmem:[#allocation57_spill] sm:$0xff] %v4461_v28 }
  0xc1   :  { %5004 = vst [vmem:[#allocation56_spill] sm:$0xff] %v4459_v29 }
  0xc3   :  { %1203 = vmatpush1.bf16.msra.mxu0 %v4286_v30  ;;  %v4457_v30 = vld [vmem:[#allocation11 + $0x18c] ss:$16 sps:$4 sm:$0xff]  }
  0xc4   :  { %1204 = vmatprep.subr.bf16.mxu0 %v4289_v31  ;;  %v4449_v31 = vld [vmem:[#allocation11 + $0x168] ss:$16 sps:$4 sm:$0xff]   ;;  %5003 = vst [vmem:[#allocation55_spill] sm:$0xff] %v4457_v30 }
  0xc5   :  { %5001 = vst [vmem:[#allocation53_spill] sm:$0xff] %v4449_v31 }
  0xc7   :  { %1205 = vmatpush1.bf16.msra.mxu0 %v4292_v32  ;;  %v4447_v32 = vld [vmem:[#allocation11 + $0x160] ss:$16 sps:$4 sm:$0xff]  }
  0xc8   :  { %1206 = vmatprep.subr.bf16.mxu0 %v4295_v33  ;;  %v4443_v33 = vld [vmem:[#allocation11 + $0x16c] ss:$16 sps:$4 sm:$0xff]   ;;  %5000 = vst [vmem:[#allocation52_spill] sm:$0xff] %v4447_v32 }
  0xc9   :  { %4999 = vst [vmem:[#allocation51_spill] sm:$0xff] %v4443_v33 }
  0xcb   :  { %1207 = vmatpush1.bf16.msra.mxu0 %v4298_v34  ;;  %v4441_v34 = vld [vmem:[#allocation11 + $0x164] ss:$16 sps:$4 sm:$0xff]  }
  0xcc   :  { %1208 = vmatprep.subr.bf16.mxu0 %v4301_v35  ;;  %v4437_v35 = vld [vmem:[#allocation11 + $0x148] ss:$16 sps:$4 sm:$0xff]  }
  0xcd   :  { %4998 = vst [vmem:[#allocation50_spill] sm:$0xff] %v4437_v35 }
  0xcf   :  { %1209 = vmatpush1.bf16.msra.mxu0 %v4304_v36  ;;  %v4435_v36 = vld [vmem:[#allocation11 + $0x140] ss:$16 sps:$4 sm:$0xff]  }
  0xd0   :  { %1210 = vmatprep.subr.bf16.mxu0 %v4307_v37  ;;  %v4433_v37 = vld [vmem:[#allocation11 + $0x14c] ss:$16 sps:$4 sm:$0xff]  }
  0xd1   :  { %4997 = vst [vmem:[#allocation49_spill] sm:$0xff] %v4433_v37 }
  0xd3   :  { %1211 = vmatpush1.bf16.msra.mxu0 %v4310_v38  ;;  %v4431_v38 = vld [vmem:[#allocation11 + $0x144] ss:$16 sps:$4 sm:$0xff]  }
  0xd4   :  { %1212 = vmatprep.subr.bf16.mxu0 %v4313_v39  ;;  %v4427_v39 = vld [vmem:[#allocation11 + $0x120] ss:$16 sps:$4 sm:$0xff]  }
  0xd7   :  { %1213 = vmatpush1.bf16.msra.mxu0 %v4316_v40  ;;  %v4424_v40 = vld [vmem:[#allocation11 + $0x124] ss:$16 sps:$4 sm:$0xff]  }
  0xd8   :  { %1214 = vmatprep.subr.bf16.mxu0 %v4433_v37  ;;  %v4455_v37 = vld [vmem:[#allocation11 + $0x184] ss:$16 sps:$4 sm:$0xff]  }
  0xd9   :  { %5002 = vst [vmem:[#allocation54_spill] sm:$0xff] %v4455_v37 }
  0xdb   :  { %1215 = vmatpush1.bf16.msra.mxu0 %v4437_v35  ;;  %v4465_v35 = vld [vmem:[#allocation11 + $0x1a4] ss:$16 sps:$4 sm:$0xff]  }
  0xdc   :  { %1216 = vmatprep.subr.bf16.mxu0 %v4443_v33  ;;  %5006 = vst [vmem:[#allocation58_spill] sm:$0xff] %v4465_v35  ;;  %v4473_v33 = vld [vmem:[#allocation11 + $0x1a8] ss:$16 sps:$4 sm:$0xff]  }
  0xdd   :  { %5009 = vst [vmem:[#allocation61_spill] sm:$0xff] %v4473_v33 }
  0xdf   :  { %1217 = vmatpush1.bf16.msra.mxu0 %v4449_v31  ;;  %v4471_v31 = vld [vmem:[#allocation11 + $0x1a0] ss:$16 sps:$4 sm:$0xff]  }
  0xe0   :  { %1218 = vmatprep.subr.bf16.mxu0 %v4457_v30  ;;  %5008 = vst [vmem:[#allocation60_spill] sm:$0xff] %v4471_v31  ;;  %v4479_v30 = vld [vmem:[#allocation11 + $0x1c4] ss:$16 sps:$4 sm:$0xff]  }
  0xe1   :  { %5010 = vst [vmem:[#allocation62_spill] sm:$0xff] %v4479_v30 }
  0xe3   :  { %1219 = vmatpush1.bf16.msra.mxu0 %v4461_v28  ;;  %v4489_v28 = vld [vmem:[#allocation11 + $0x1e4] ss:$16 sps:$4 sm:$0xff]  }
  0xe4   :  { %1220 = vmatprep.subr.bf16.mxu0 %v4467_v27  ;;  %5014 = vst [vmem:[#allocation66_spill] sm:$0xff] %v4489_v28  ;;  %v4497_v27 = vld [vmem:[#allocation11 + $0x1e8] ss:$16 sps:$4 sm:$0xff]  }
  0xe5   :  { %5017 = vst [vmem:[#allocation69_spill] sm:$0xff] %v4497_v27 }
  0xe7   :  { %1221 = vmatpush1.bf16.msra.mxu0 %v4473_v33  ;;  %v4495_v33 = vld [vmem:[#allocation11 + $0x1e0] ss:$16 sps:$4 sm:$0xff]  }
  0xe8   :  { %1222 = vmatprep.subr.bf16.mxu0 %v4481_v26  ;;  %5016 = vst [vmem:[#allocation68_spill] sm:$0xff] %v4495_v33  ;;  %v4503_v26 = vld [vmem:[#allocation11 + $0x204] ss:$16 sps:$4 sm:$0xff]  }
  0xe9   :  { %5018 = vst [vmem:[#allocation70_spill] sm:$0xff] %v4503_v26 }
  0xeb   :  { %1223 = vmatpush1.bf16.msra.mxu0 %v4485_v24 }
  0xec   :  { %1224 = vmatprep.subr.bf16.mxu0 %v4491_v23 }
  0xef   :  { %1225 = vmatpush1.bf16.msra.mxu0 %v4497_v27 }
  0xf0   :  { %1237 = vmatprep.subr.bf16.mxu0 %v4505_v21 }
 0x185   :  { %v309_v46 = vpop.f32.mrb[0].mxu0 }
 0x186   :  { %v310_v47 = vadd.f32 %v309_v46, %v188_v45  ;;  %v311_v49 = vpop.f32.mrb[1].mxu0 }
 0x187   :  { %v313_v50 = vpop.f32.mrb[2].mxu0  ;;  %v312_v59 = vadd.f32 %v311_v49, %v192_v55  ;;  %v4359_v49 = vld [vmem:[#allocation11 + $0x4] ss:$16 sps:$4 sm:$0xff]  }
 0x188   :  { %v318_v52 = vpack.c.bf16 %v310_v47, %v310_v47  ;;  %v314_v53 = vadd.f32 %v313_v50, %v188_v45  ;;  %v315_v54 = vpop.f32.mrb[3].mxu0  ;;  %v153_v45 = vld [vmem:[%s4883_s0 + $0x8] sm:$0xff] }
 0x189   :  { %v319_v62 = vpack.c.bf16 %v312_v59, %v312_v59  ;;  %v316_v44 = vadd.f32 %v315_v54, %v192_v55  ;;  %v4357_v47 = vpack.c.bf16 %v153_v45, %v153_v45  ;;  %v4374_v54 = vld [vmem:[#allocation11 + $0x24] ss:$16 sps:$4 sm:$0xff]   ;;  %v4379_v55 = vld [vmem:[#allocation11 + $0x20] ss:$16 sps:$4 sm:$0xff]  }
 0x18a   :  { %v320_v56 = vpack.c.bf16 %v314_v53, %v314_v53  ;;  %v328_v57 = vsel %vm326_vm1, %v318_v52, 0  ;;  %v4370_v52 = vpack.c.bf16 %v155_v51, %v155_v51  ;;  %v4372_v53 = vld [vmem:[#allocation11] ss:$16 sps:$4 sm:$0xff]   ;;  %v4388_v59 = vld [vmem:[#allocation11 + $0x64] ss:$16 sps:$4 sm:$0xff]  }
 0x18b   :  { %3396 = vmatpush3.bf16.msra.mxu1 %v328_v57  ;;  %v420_v41 = vsel %vm326_vm1, %v319_v62, 0  ;;  %v321_v46 = vpack.c.bf16 %v316_v44, %v316_v44  ;;  %4995 = vst [vmem:[#allocation47_spill] sm:$0xff] %v4357_v47  ;;  %v4385_v57 = vld [vmem:[#allocation11 + $0x40] ss:$16 sps:$4 sm:$0xff]   ;;  %v4406_v45 = vld [vmem:[#allocation11 + $0xc4] ss:$16 sps:$4 sm:$0xff]  }
 0x18c   :  { %3401 = vmatprep.subr.bf16.mxu1 %v4898_v20  ;;  %v374_v60 = vsel %vm326_vm1, %v320_v56, 0  ;;  %4996 = vst [vmem:[#allocation48_spill] sm:$0xff] %v4370_v52  ;;  %v4382_v56 = vld [vmem:[#allocation11 + $0x44] ss:$16 sps:$4 sm:$0xff]   ;;  %v4397_v62 = vld [vmem:[#allocation11 + $0x80] ss:$16 sps:$4 sm:$0xff]  }
 0x18d   :  { %v466_v50 = vsel %vm326_vm1, %v321_v46, 0  ;;  %v4403_v44 = vld [vmem:[#allocation11 + $0xa0] ss:$16 sps:$4 sm:$0xff]  }
 0x18e   :  { %3398 = vmatmul.mubr.msk.bf16.vlgmr.msra.gmra.mrb[0].mxu1 %vm322_vm2, %v4334_v58  ;;  %v4409_v46 = vld [vmem:[#allocation11 + $0xc0] ss:$16 sps:$4 sm:$0xff]  }
 0x18f   :  { %3402 = vmatpush3.bf16.msra.mxu1 %v374_v60  ;;  %3403 = vmatprep.mubr.msk.bf16.mxu1 %vm3992_vm0, %v4898_v20  ;;  %v4391_v60 = vld [vmem:[#allocation11 + $0x60] ss:$16 sps:$4 sm:$0xff]  }
 0x190   :  { %3407 = vmatprep.subr.bf16.mxu1 %v4898_v20  ;;  %v4415_v51 = vld [vmem:[#allocation11 + $0xe0] ss:$16 sps:$4 sm:$0xff]  }
 0x196   :  { %3404 = vmatmul.mubr.msk.bf16.vlgmr.msra.gmra.mrb[4].mxu1 %vm322_vm2, %v4346_v63 }
 0x197   :  { %3408 = vmatpush3.bf16.msra.mxu1 %v420_v41  ;;  %3409 = vmatprep.mubr.msk.bf16.mxu1 %vm3992_vm0, %v4898_v20  ;;  %v4400_v41 = vld [vmem:[#allocation11 + $0xa4] ss:$16 sps:$4 sm:$0xff]  }
 0x198   :  { %3413 = vmatprep.subr.bf16.mxu1 %v4898_v20 }
 0x19e   :  { %3410 = vmatmul.mubr.msk.bf16.vlgmr.msra.gmra.mrb[8].mxu1 %vm322_vm2, %v4357_v47 }
 0x19f   :  { %3414 = vmatpush3.bf16.msra.mxu1 %v466_v50  ;;  %3415 = vmatprep.mubr.msk.bf16.mxu1 %vm3992_vm0, %v4898_v20  ;;  %v4412_v50 = vld [vmem:[#allocation11 + $0xe4] ss:$16 sps:$4 sm:$0xff]  }
 0x1a0   :  { %1108 = vmatprep.subr.bf16.mxu1 %v4359_v49  ;;  %v4418_v20 = vld [vmem:[#allocation11 + $0x104] ss:$16 sps:$4 sm:$0xff]  }
 0x1a6   :  { %3416 = vmatmul.mubr.msk.bf16.vlgmr.msra.gmra.mrb[12].mxu1 %vm322_vm2, %v4370_v52 }
 0x1a7   :  { %1109 = vmatpush1.bf16.msra.mxu1 %v4372_v53 }
 0x1a8   :  { %1110 = vmatprep.subr.bf16.mxu1 %v4374_v54 }
 0x1ab   :  { %1111 = vmatpush1.bf16.msra.mxu1 %v4379_v55 }
 0x1ac   :  { %1112 = vmatprep.subr.bf16.mxu1 %v4382_v56 }
 0x1af   :  { %1113 = vmatpush1.bf16.msra.mxu1 %v4385_v57 }
 0x1b0   :  { %1114 = vmatprep.subr.bf16.mxu1 %v4388_v59 }
 0x1b3   :  { %1115 = vmatpush1.bf16.msra.mxu1 %v4391_v60 }
 0x1b4   :  { %1116 = vmatprep.subr.bf16.mxu1 %v4394_v61 }
 0x1b7   :  { %1117 = vmatpush1.bf16.msra.mxu1 %v4397_v62 }
 0x1b8   :  { %1118 = vmatprep.subr.bf16.mxu1 %v4400_v41 }
 0x1bb   :  { %1119 = vmatpush1.bf16.msra.mxu1 %v4403_v44 }
 0x1bc   :  { %1120 = vmatprep.subr.bf16.mxu1 %v4406_v45 }
 0x1bf   :  { %1121 = vmatpush1.bf16.msra.mxu1 %v4409_v46 }
 0x1c0   :  { %1122 = vmatprep.subr.bf16.mxu1 %v4412_v50 }
 0x1c3   :  { %1123 = vmatpush1.bf16.msra.mxu1 %v4415_v51 }
 0x1c4   :  { %1124 = vmatprep.subr.bf16.mxu1 %v4418_v20 }
 0x1c7   :  { %1125 = vmatpush1.bf16.msra.mxu1 %v4421_v0 }
 0x1c8   :  { %1126 = vmatprep.subr.bf16.mxu1 %v4424_v40 }
 0x1cb   :  { %1127 = vmatpush1.bf16.msra.mxu1 %v4427_v39 }
 0x1cc   :  { %1128 = vmatprep.subr.bf16.mxu1 %v4431_v38 }
 0x1cf   :  { %1129 = vmatpush1.bf16.msra.mxu1 %v4435_v36 }
 0x1d0   :  { %1130 = vmatprep.subr.bf16.mxu1 %v4441_v34 }
 0x1d3   :  { %1131 = vmatpush1.bf16.msra.mxu1 %v4447_v32  ;;  %v4509_v32 = vld [vmem:[#allocation11 + $0x200] ss:$16 sps:$4 sm:$0xff]  }
 0x1d4   :  { %1132 = vmatprep.subr.bf16.mxu1 %v4455_v37 }
 0x1d7   :  { %1133 = vmatpush1.bf16.msra.mxu1 %v4459_v29 }
 0x1d8   :  { %1134 = vmatprep.subr.bf16.mxu1 %v4465_v35 }
 0x1db   :  { %1135 = vmatpush1.bf16.msra.mxu1 %v4471_v31 }
 0x1dc   :  { %1136 = vmatprep.subr.bf16.mxu1 %v4479_v30 }
 0x1df   :  { %1137 = vmatpush1.bf16.msra.mxu1 %v4483_v25 }
 0x1e0   :  { %1138 = vmatprep.subr.bf16.mxu1 %v4489_v28 }
 0x1e3   :  { %1139 = vmatpush1.bf16.msra.mxu1 %v4495_v33 }
 0x1e4   :  { %1151 = vmatprep.subr.bf16.mxu1 %v4503_v26  ;;  %v4511_v26 = vld [vmem:[#allocation11 + $0x208] ss:$16 sps:$4 sm:$0xff]  }
 0x261   :  { %v364_v24 = vpop.f32.mrb[0].mxu1 }
 0x262   :  { %v3399_v52 = vpop.f32.mrb[1].mxu1 }
 0x263   :  { %v367_v22 = vpop.f32.mrb[2].mxu1  ;;  %v4513_v52 = vld [vmem:[#allocation11 + $0x224] ss:$16 sps:$4 sm:$0xff]  }
 0x264   :  { %v3400_v47 = vpop.f32.mrb[3].mxu1  ;;  %v4515_v22 = vld [vmem:[#allocation11 + $0x22c] ss:$16 sps:$4 sm:$0xff]  }
 0x265   :  { %v4557_v47 = vld [vmem:[#allocation11 + $0x280] ss:$16 sps:$4 sm:$0xff]  }
 0x266   :  { %5028 = vst [vmem:[#allocation79_spill] sm:$0xff] %v4557_v47 }
 0x269   :  { %v410_v63 = vpop.f32.mrb[4].mxu1 }
 0x26a   :  { %v508_v58 = vpack.c.bf16 %v410_v63, %v364_v24  ;;  %v3405_v28 = vpop.f32.mrb[5].mxu1  ;;  %v4553_v63 = vld [vmem:[#allocation11 + $0x28c] ss:$16 sps:$4 sm:$0xff]  }
 0x26b   :  { %v413_v23 = vpop.f32.mrb[6].mxu1  ;;  %v5020_v28 = vmov 0   ;;  %5027 = vst [vmem:[#allocation78_spill] sm:$0xff] %v4553_v63 }
 0x26c   :  { %v3406_v25 = vpop.f32.mrb[7].mxu1  ;;  %v4519_v23 = vld [vmem:[#allocation11 + $0x220] ss:$16 sps:$4 sm:$0xff]  }
 0x26d   :  { %v4521_v25 = vld [vmem:[#allocation11 + $0x228] ss:$16 sps:$4 sm:$0xff]  }
 0x271   :  { %v456_v33 = vpop.f32.mrb[8].mxu1 }
 0x272   :  { %v3411_v30 = vpop.f32.mrb[9].mxu1 }
 0x273   :  { %v459_v27 = vpop.f32.mrb[10].mxu1  ;;  %v4535_v30 = vld [vmem:[#allocation11 + $0x248] ss:$16 sps:$4 sm:$0xff]  }
 0x274   :  { %v3412_v31 = vpop.f32.mrb[11].mxu1  ;;  %v4527_v27 = vld [vmem:[#allocation11 + $0x24c] ss:$16 sps:$4 sm:$0xff]   ;;  %5021 = vst [vmem:[#allocation72_spill] sm:$0xff] %v4535_v30 }
 0x275   :  { %v4539_v31 = vld [vmem:[#allocation11 + $0x264] ss:$16 sps:$4 sm:$0xff]  }
 0x276   :  { %5022 = vst [vmem:[#allocation73_spill] sm:$0xff] %v4539_v31 }
 0x279   :  { %v502_v35 = vpop.f32.mrb[12].mxu1 }
 0x27a   :  { %v509_v29 = vpack.c.bf16 %v502_v35, %v456_v33  ;;  %v3417_v37 = vpop.f32.mrb[13].mxu1  ;;  %v4541_v33 = vld [vmem:[#allocation11 + $0x26c] ss:$16 sps:$4 sm:$0xff]   ;;  %v4545_v35 = vld [vmem:[#allocation11 + $0x260] ss:$16 sps:$4 sm:$0xff]  }
 0x27b   :  { %v505_v21 = vpop.f32.mrb[14].mxu1  ;;  %5023 = vst [vmem:[#allocation74_spill] sm:$0xff] %v4541_v33  ;;  %5024 = vst [vmem:[#allocation75_spill] sm:$0xff] %v4545_v35  ;;  %v4547_v37 = vld [vmem:[#allocation11 + $0x268] ss:$16 sps:$4 sm:$0xff]  }
 0x27c   :  { %v3418_v24 = vpop.f32.mrb[15].mxu1  ;;  %1140 = vmatprep.mubr.bf16.mxu1 %v509_v29  ;;  %1226 = vmatprep.mubr.bf16.mxu0 %v509_v29  ;;  %v4525_v21 = vld [vmem:[#allocation11 + $0x244] ss:$16 sps:$4 sm:$0xff]   ;;  %v4533_v29 = vld [vmem:[#allocation11 + $0x240] ss:$16 sps:$4 sm:$0xff]   ;;  %5025 = vst [vmem:[#allocation76_spill] sm:$0xff] %v4547_v37 }
 0x27d   :  { %1141 = vmatmul.mubr.bf16.vlgmr.msra.gmra.mrb[16].mxu1 %v508_v58  ;;  %1227 = vmatmul.mubr.bf16.vlgmr.msra.gmra.mrb[4].mxu0 %v508_v58  ;;  %v4551_v58 = vld [vmem:[#allocation11 + $0x284] ss:$16 sps:$4 sm:$0xff]   ;;  %v4559_v24 = vld [vmem:[#allocation11 + $0x288] ss:$16 sps:$4 sm:$0xff]  }
 0x27e   :  { %1152 = vmatpush1.bf16.msra.mxu1 %v4509_v32  ;;  %1238 = vmatpush1.bf16.msra.mxu0 %v4511_v26  ;;  %5026 = vst [vmem:[#allocation77_spill] sm:$0xff] %v4551_v58  ;;  %5029 = vst [vmem:[#allocation80_spill] sm:$0xff] %v4559_v24 }
 0x27f   :  { %1153 = vmatprep.subr.bf16.mxu1 %v4513_v52  ;;  %1239 = vmatprep.subr.bf16.mxu0 %v4515_v22 }
 0x280   :  { %1183 = vmatprep.mubr.bf16.mxu1 %v5020_v28  ;;  %1269 = vmatprep.mubr.bf16.mxu0 %v5020_v28 }
 0x282   :  { %1154 = vmatpush1.bf16.msra.mxu1 %v4519_v23  ;;  %1240 = vmatpush1.bf16.msra.mxu0 %v4521_v25 }
 0x283   :  { %1155 = vmatprep.subr.bf16.mxu1 %v4525_v21  ;;  %1241 = vmatprep.subr.bf16.mxu0 %v4527_v27 }
 0x286   :  { %1156 = vmatpush1.bf16.msra.mxu1 %v4533_v29  ;;  %1242 = vmatpush1.bf16.msra.mxu0 %v4535_v30  ;;  %v4563_v30 = vld [vmem:[#allocation11 + $0x2a4] ss:$16 sps:$4 sm:$0xff]  }
 0x287   :  { %1157 = vmatprep.subr.bf16.mxu1 %v4539_v31  ;;  %1243 = vmatprep.subr.bf16.mxu0 %v4541_v33  ;;  %5030 = vst [vmem:[#allocation81_spill] sm:$0xff] %v4563_v30  ;;  %v4565_v31 = vld [vmem:[#allocation11 + $0x2ac] ss:$16 sps:$4 sm:$0xff]   ;;  %v4569_v33 = vld [vmem:[#allocation11 + $0x2a0] ss:$16 sps:$4 sm:$0xff]  }
 0x288   :  { %5031 = vst [vmem:[#allocation82_spill] sm:$0xff] %v4565_v31  ;;  %5032 = vst [vmem:[#allocation83_spill] sm:$0xff] %v4569_v33 }
 0x28a   :  { %1158 = vmatpush1.bf16.msra.mxu1 %v4545_v35  ;;  %1244 = vmatpush1.bf16.msra.mxu0 %v4547_v37  ;;  %v4571_v35 = vld [vmem:[#allocation11 + $0x2a8] ss:$16 sps:$4 sm:$0xff]   ;;  %v4575_v37 = vld [vmem:[#allocation11 + $0x2c4] ss:$16 sps:$4 sm:$0xff]  }
 0x28b   :  { %1159 = vmatprep.subr.bf16.mxu1 %v4551_v58  ;;  %1245 = vmatprep.subr.bf16.mxu0 %v4553_v63  ;;  %v4577_v58 = vld [vmem:[#allocation11 + $0x2cc] ss:$16 sps:$4 sm:$0xff]   ;;  %v4581_v63 = vld [vmem:[#allocation11 + $0x2c0] ss:$16 sps:$4 sm:$0xff]  }
 0x28c   :  { %5033 = vst [vmem:[#allocation84_spill] sm:$0xff] %v4577_v58  ;;  %5034 = vst [vmem:[#allocation85_spill] sm:$0xff] %v4581_v63 }
 0x28e   :  { %1160 = vmatpush1.bf16.msra.mxu1 %v4557_v47  ;;  %1246 = vmatpush1.bf16.msra.mxu0 %v4559_v24  ;;  %v4583_v47 = vld [vmem:[#allocation11 + $0x2c8] ss:$16 sps:$4 sm:$0xff]   ;;  %v4587_v24 = vld [vmem:[#allocation11 + $0x2e4] ss:$16 sps:$4 sm:$0xff]  }
 0x28f   :  { %1161 = vmatprep.subr.bf16.mxu1 %v4563_v30  ;;  %1247 = vmatprep.subr.bf16.mxu0 %v4565_v31  ;;  %5035 = vst [vmem:[#allocation86_spill] sm:$0xff] %v4583_v47  ;;  %5036 = vst [vmem:[#allocation87_spill] sm:$0xff] %v4587_v24  ;;  %v4589_v30 = vld [vmem:[#allocation11 + $0x2ec] ss:$16 sps:$4 sm:$0xff]   ;;  %v4593_v31 = vld [vmem:[#allocation11 + $0x2e0] ss:$16 sps:$4 sm:$0xff]  }
 0x290   :  { %5037 = vst [vmem:[#allocation88_spill] sm:$0xff] %v4589_v30  ;;  %5038 = vst [vmem:[#allocation89_spill] sm:$0xff] %v4593_v31 }
 0x292   :  { %1162 = vmatpush1.bf16.msra.mxu1 %v4569_v33  ;;  %1248 = vmatpush1.bf16.msra.mxu0 %v4571_v35  ;;  %v4595_v33 = vld [vmem:[#allocation11 + $0x2e8] ss:$16 sps:$4 sm:$0xff]  }
 0x293   :  { %1163 = vmatprep.subr.bf16.mxu1 %v4575_v37  ;;  %1249 = vmatprep.subr.bf16.mxu0 %v4577_v58  ;;  %5039 = vst [vmem:[#allocation90_spill] sm:$0xff] %v4595_v33  ;;  %v5040_v58 = vmov 0.0  }
 0x296   :  { %1164 = vmatpush1.bf16.msra.mxu1 %v4581_v63  ;;  %1250 = vmatpush1.bf16.msra.mxu0 %v4583_v47 }
 0x297   :  { %1165 = vmatprep.subr.bf16.mxu1 %v4587_v24  ;;  %1251 = vmatprep.subr.bf16.mxu0 %v4589_v30 }
 0x29a   :  { %1166 = vmatpush1.bf16.msra.mxu1 %v4593_v31  ;;  %1252 = vmatpush1.bf16.msra.mxu0 %v4595_v33 }
 0x29b   :  { %1431 = vmatprep.subr.bf16.mxu1 %v4200_v1  ;;  %3419 = vmatprep.subr.bf16.mxu0 %v5040_v58  ;;  %v606_v1 = vld [vmem:[#allocation12] sm:$0xf] }
 0x29d   :  { %1184 = vmatmul.mubr.bf16.vlgmr.msra.gmra.mrb[16].mxu1 %v4253_v19  ;;  %1270 = vmatmul.mubr.bf16.vlgmr.msra.gmra.mrb[4].mxu0 %v4253_v19 }
 0x29e   :  { %1432 = vmatpush1.bf16.msra.mxu1 %v4202_v2  ;;  %1463 = vmatprep.mubr.bf16.mxu1 %v5020_v28  ;;  %v611_v2 = vrot.slane %v606_v1, %v4323_v43 }
 0x29f   :  { %1433 = vmatprep.subr.bf16.mxu1 %v4205_v3  ;;  %3421 = vmatprep.mubr.msk.bf16.mxu0 %vm3992_vm0, %v5040_v58  ;;  %v615_v3 = vrot.slane %v606_v1, %v4327_v48 }
 0x2a2   :  { %1434 = vmatpush1.bf16.msra.mxu1 %v4208_v4 }
 0x2a3   :  { %1435 = vmatprep.subr.bf16.mxu1 %v4211_v5 }
 0x2a6   :  { %1436 = vmatpush1.bf16.msra.mxu1 %v4214_v6 }
 0x2a7   :  { %1437 = vmatprep.subr.bf16.mxu1 %v4217_v7 }
 0x2aa   :  { %1438 = vmatpush1.bf16.msra.mxu1 %v4220_v8 }
 0x2ab   :  { %1439 = vmatprep.subr.bf16.mxu1 %v4222_v9 }
 0x2ae   :  { %1440 = vmatpush1.bf16.msra.mxu1 %v4225_v10 }
 0x2af   :  { %1441 = vmatprep.subr.bf16.mxu1 %v4227_v11 }
 0x2b2   :  { %1442 = vmatpush1.bf16.msra.mxu1 %v4231_v12 }
 0x2b3   :  { %1443 = vmatprep.subr.bf16.mxu1 %v4233_v13 }
 0x2b6   :  { %1444 = vmatpush1.bf16.msra.mxu1 %v4237_v14 }
 0x2b7   :  { %1445 = vmatprep.subr.bf16.mxu1 %v4239_v15 }
 0x2ba   :  { %1446 = vmatpush1.bf16.msra.mxu1 %v4243_v16 }
 0x2bb   :  { %2250 = vmatprep.subr.bf16.mxu1 %v4359_v49 }
 0x370   :  { %v1185_v4 = vpop.f32.mrb[16].mxu1  ;;  %v1271_v5 = vpop.f32.mrb[4].mxu0 }
 0x371   :  { %v3443_v6 = vadd.f32 %v1185_v4, %v611_v2  ;;  %v1187_v7 = vpop.f32.mrb[17].mxu1  ;;  %v1273_v8 = vpop.f32.mrb[5].mxu0 }
 0x372   :  { %v3444_v9 = vadd.f32 %v1187_v7, %v615_v3  ;;  %v1189_v10 = vpop.f32.mrb[18].mxu1  ;;  %v1275_v11 = vpop.f32.mrb[6].mxu0  ;;  %v4627_v7 = vsub.s32 3, %v4320_v42 }
 0x373   :  { %v3197_v12 = vmul.f32 -1.442695, %v3443_v6  ;;  %v3445_v13 = vadd.f32 %v1189_v10, %v611_v2  ;;  %v1191_v14 = vpop.f32.mrb[19].mxu1  ;;  %v1277_v15 = vpop.f32.mrb[7].mxu0  ;;  %v4630_v2 = vsub.s32 2, %v4320_v42 }
 0x374   :  { %v3446_v16 = vadd.f32 %v1191_v14, %v615_v3  ;;  %v3199_v49 = vmul.f32 -1.442695, %v3444_v9  ;;  %5041 = vst [vmem:[#allocation91_spill] sm:$0xff] %v4627_v7  ;;  %v623_v9 = vrot.slane %v606_v1, %v4627_v7 }
 0x375   :  { %3720 = vpow2.f32 %v3197_v12  ;;  %v3198_v19 = vmul.f32 -1.442695, %v3445_v13  ;;  %v619_v12 = vrot.slane %v606_v1, %v4630_v2 }
 0x376   :  { %v3200_v33 = vmul.f32 -1.442695, %v3446_v16  ;;  %v3450_v16 = vadd.f32 %v1277_v15, %v623_v9 }
 0x377   :  { %3722 = vpow2.f32 %v3198_v19 }
 0x378   :  { %3724 = vpow2.f32 %v3199_v49 }
 0x379   :  { %3726 = vpow2.f32 %v3200_v33 }
 0x37f   :  { %v3721_v31 = vpop.eup %3720 }
 0x380   :  { %v1286_v30 = vadd.f32 1.0, %v3721_v31  ;;  %v3448_v31 = vadd.f32 %v1273_v8, %v623_v9 }
 0x381   :  { %v3723_v4 = vpop.eup %3722 }
 0x382   :  { %3728 = vrcp.f32 %v1286_v30  ;;  %v1287_v24 = vadd.f32 1.0, %v3723_v4  ;;  %v3725_v6 = vpop.eup %3724  ;;  %v3447_v30 = vadd.f32 %v1271_v5, %v619_v12 }
 0x383   :  { %v3727_v3 = vpop.eup %3726  ;;  %v1298_v10 = vadd.f32 1.0, %v3725_v6 }
 0x384   :  { %3730 = vrcp.f32 %v1287_v24  ;;  %v1299_v33 = vadd.f32 1.0, %v3727_v3  ;;  %v3449_v24 = vadd.f32 %v1275_v11, %v619_v12  ;;  %v5053_v12 = vld [vmem:[#allocation46_spill] sm:$0xff] }
 0x385   :  { %3732 = vrcp.f32 %v1298_v10 }
 0x386   :  { %3734 = vrcp.f32 %v1299_v33 }
 0x38c   :  { %v3729_v13 = vpop.eup %3728 }
 0x38d   :  { %v1304_v14 = vmul.f32 %v3729_v13, %v3448_v31 }
 0x38e   :  { %v3731_v19 = vpop.eup %3730 }
 0x38f   :  { %v1306_v49 = vadd.f32 %v3447_v30, %v1304_v14  ;;  %v1305_v4 = vmul.f32 %v3731_v19, %v3450_v16  ;;  %v3733_v6 = vpop.eup %3732  ;;  %v5054_v30 = vld [vmem:[#allocation47_spill] sm:$0xff]  ;;  %v5055_v14 = vld [vmem:[#allocation25_spill] sm:$0xff]  ;;  %v5056_v16 = vld [vmem:[#allocation48_spill] sm:$0xff] }
 0x390   :  { %v3735_v47 = vpop.eup %3734  ;;  %v1310_v7 = vsub.f32 1.0, %v3733_v6  ;;  %v5057_v19 = vld [vmem:[#allocation24_spill] sm:$0xff] }
 0x391   :  { %3736 = vtanh.f32 %v1306_v49  ;;  %v1307_v42 = vadd.f32 %v3449_v24, %v1305_v4  ;;  %v1311_v63 = vsub.f32 1.0, %v3735_v47  ;;  %v5058_v49 = vld [vmem:[#allocation26_spill] sm:$0xff]  ;;  %v5059_v24 = vld [vmem:[#allocation27_spill] sm:$0xff]  ;;  %v5060_v4 = vld [vmem:[#allocation28_spill] sm:$0xff] }
 0x392   :  { %v1312_v3 = vmul.f32 %v1310_v7, %v4245_v17  ;;  %v5042_v17 = vld [vmem:[#allocation52_spill] sm:$0xff] }
 0x393   :  { %3738 = vtanh.f32 %v1307_v42  ;;  %v1313_v5 = vmul.f32 %v1311_v63, %v4247_v18  ;;  %v5043_v18 = vld [vmem:[#allocation54_spill] sm:$0xff]  ;;  %v5044_v42 = vld [vmem:[#allocation56_spill] sm:$0xff] }
 0x39b   :  { %v3737_v1 = vpop.eup %3736 }
 0x39c   :  { %v1314_v8 = vmul.f32 %v3737_v1, %v3733_v6  ;;  %v5061_v6 = vld [vmem:[#allocation29_spill] sm:$0xff]  ;;  %v5062_v1 = vld [vmem:[#allocation30_spill] sm:$0xff] }
 0x39d   :  { %v3739_v10 = vpop.eup %3738 }
 0x39e   :  { %v1315_v33 = vmul.f32 %v3739_v10, %v3735_v47  ;;  %v4636_v15 = vadd.f32 %v1314_v8, %v1312_v3  ;;  %v5063_v3 = vld [vmem:[#allocation31_spill] sm:$0xff]  ;;  %v5065_v8 = vld [vmem:[#allocation33_spill] sm:$0xff]  ;;  %v5066_v10 = vld [vmem:[#allocation34_spill] sm:$0xff] }
 0x3a0   :  { %v4638_v9 = vadd.f32 %v1315_v33, %v1313_v5  ;;  %v5067_v5 = vld [vmem:[#allocation35_spill] sm:$0xff]  ;;  %v5068_v33 = vld [vmem:[#allocation36_spill] sm:$0xff] }
 0x3a2   :  { %v4642_v11 = vpack.c.bf16 %v4638_v9, %v4636_v15 }
 0x3a4   :  { %1464 = vmatmul.mubr.bf16.vlgmr.msra.gmra.mrb[20].mxu1 %v4642_v11 }
 0x3a5   :  { %2251 = vmatpush1.bf16.msra.mxu1 %v4372_v53  ;;  %v5045_v53 = vld [vmem:[#allocation58_spill] sm:$0xff] }
 0x3a6   :  { %2252 = vmatprep.subr.bf16.mxu1 %v4374_v54 }
 0x3a9   :  { %2253 = vmatpush1.bf16.msra.mxu1 %v4379_v55 }
 0x3aa   :  { %2254 = vmatprep.subr.bf16.mxu1 %v4382_v56 }
 0x3ad   :  { %2255 = vmatpush1.bf16.msra.mxu1 %v4385_v57 }
 0x3ae   :  { %2256 = vmatprep.subr.bf16.mxu1 %v4388_v59 }
 0x3b1   :  { %2257 = vmatpush1.bf16.msra.mxu1 %v4391_v60 }
 0x3b2   :  { %2258 = vmatprep.subr.bf16.mxu1 %v4394_v61 }
 0x3b5   :  { %2259 = vmatpush1.bf16.msra.mxu1 %v4397_v62 }
 0x3b6   :  { %2260 = vmatprep.subr.bf16.mxu1 %v4400_v41 }
 0x3b9   :  { %2261 = vmatpush1.bf16.msra.mxu1 %v4403_v44 }
 0x3ba   :  { %2262 = vmatprep.subr.bf16.mxu1 %v4406_v45 }
 0x3bd   :  { %2263 = vmatpush1.bf16.msra.mxu1 %v4409_v46 }
 0x3be   :  { %2264 = vmatprep.subr.bf16.mxu1 %v4412_v50 }
 0x3c1   :  { %2265 = vmatpush1.bf16.msra.mxu1 %v4415_v51  ;;  %v5052_v51 = vld [vmem:[#allocation45_spill] sm:$0xff] }
 0x3c2   :  { %2266 = vmatprep.subr.bf16.mxu1 %v4418_v20  ;;  %v5046_v20 = vld [vmem:[#allocation60_spill] sm:$0xff] }
 0x3c5   :  { %2267 = vmatpush1.bf16.msra.mxu1 %v4421_v0  ;;  %v5047_v0 = vld [vmem:[#allocation62_spill] sm:$0xff] }
 0x3c6   :  { %2268 = vmatprep.subr.bf16.mxu1 %v4424_v40  ;;  %v5048_v40 = vld [vmem:[#allocation64_spill] sm:$0xff] }
 0x3c9   :  { %2269 = vmatpush1.bf16.msra.mxu1 %v4427_v39  ;;  %v5049_v39 = vld [vmem:[#allocation66_spill] sm:$0xff] }
 0x3ca   :  { %2270 = vmatprep.subr.bf16.mxu1 %v4431_v38  ;;  %v5050_v38 = vld [vmem:[#allocation68_spill] sm:$0xff] }
 0x3cd   :  { %2271 = vmatpush1.bf16.msra.mxu1 %v4435_v36  ;;  %v5051_v36 = vld [vmem:[#allocation70_spill] sm:$0xff] }
 0x3ce   :  { %2272 = vmatprep.subr.bf16.mxu1 %v4441_v34  ;;  %v1339_v34 = vld [vmem:[#allocation9] sm:$0x3] }
 0x3cf   :  { %v1344_v54 = vrot.slane %v1339_v34, %v4323_v43  ;;  %v1348_v44 = vrot.slane %v1339_v34, %v4327_v48  ;;  %v5079_v34 = vld [vmem:[#allocation53_spill] sm:$0xff] }
 0x3d1   :  { %2273 = vmatpush1.bf16.msra.mxu1 %v5042_v17  ;;  %v5069_v17 = vld [vmem:[#allocation37_spill] sm:$0xff] }
 0x3d2   :  { %2274 = vmatprep.subr.bf16.mxu1 %v5043_v18  ;;  %v5070_v18 = vld [vmem:[#allocation38_spill] sm:$0xff] }
 0x3d5   :  { %2275 = vmatpush1.bf16.msra.mxu1 %v5044_v42  ;;  %v5071_v42 = vld [vmem:[#allocation39_spill] sm:$0xff] }
 0x3d6   :  { %2276 = vmatprep.subr.bf16.mxu1 %v5045_v53  ;;  %v5072_v53 = vld [vmem:[#allocation40_spill] sm:$0xff] }
 0x3d9   :  { %2277 = vmatpush1.bf16.msra.mxu1 %v5046_v20  ;;  %v5073_v20 = vld [vmem:[#allocation41_spill] sm:$0xff] }
 0x3da   :  { %2278 = vmatprep.subr.bf16.mxu1 %v5047_v0  ;;  %v5074_v0 = vld [vmem:[#allocation42_spill] sm:$0xff] }
 0x3dd   :  { %2279 = vmatpush1.bf16.msra.mxu1 %v5048_v40  ;;  %v5075_v40 = vld [vmem:[#allocation43_spill] sm:$0xff] }
 0x3de   :  { %2280 = vmatprep.subr.bf16.mxu1 %v5049_v39  ;;  %v5076_v39 = vld [vmem:[#allocation49_spill] sm:$0xff] }
 0x3e1   :  { %2281 = vmatpush1.bf16.msra.mxu1 %v5050_v38  ;;  %v5077_v38 = vld [vmem:[#allocation50_spill] sm:$0xff] }
 0x3e2   :  { %2293 = vmatprep.subr.bf16.mxu1 %v5051_v36  ;;  %v5078_v36 = vld [vmem:[#allocation51_spill] sm:$0xff] }
 0x477   :  { %v1465_v55 = vpop.f32.mrb[20].mxu1 }
 0x478   :  { %v1466_v56 = vadd.f32 %v1465_v55, %v1344_v54  ;;  %v1467_v57 = vpop.f32.mrb[21].mxu1  ;;  %v5081_v55 = vld [vmem:[#allocation57_spill] sm:$0xff] }
 0x479   :  { %v1469_v59 = vpop.f32.mrb[22].mxu1  ;;  %v1468_v46 = vadd.f32 %v1467_v57, %v1348_v44  ;;  %v5083_v57 = vld [vmem:[#allocation61_spill] sm:$0xff] }
 0x47a   :  { %v1474_v60 = vpack.c.bf16 %v1466_v56, %v1466_v56  ;;  %v1470_v61 = vadd.f32 %v1469_v59, %v1344_v54  ;;  %v1471_v62 = vpop.f32.mrb[23].mxu1  ;;  %v5080_v54 = vld [vmem:[#allocation55_spill] sm:$0xff] }
 0x47b   :  { %v1475_v63 = vpack.c.bf16 %v1468_v46, %v1468_v46  ;;  %v1472_v7 = vadd.f32 %v1471_v62, %v1348_v44  ;;  %v5082_v56 = vld [vmem:[#allocation59_spill] sm:$0xff]  ;;  %v5087_v62 = vld [vmem:[#allocation69_spill] sm:$0xff] }
 0x47c   :  { %v1479_v41 = vsel %vm326_vm1, %v1474_v60, 0  ;;  %v1476_v45 = vpack.c.bf16 %v1470_v61, %v1470_v61  ;;  %v5084_v59 = vld [vmem:[#allocation63_spill] sm:$0xff]  ;;  %v5085_v60 = vld [vmem:[#allocation65_spill] sm:$0xff] }
 0x47d   :  { %3420 = vmatpush3.bf16.msra.mxu0 %v1479_v41  ;;  %v1565_v47 = vsel %vm326_vm1, %v1475_v63, 0  ;;  %v1477_v31 = vpack.c.bf16 %v1472_v7, %v1472_v7  ;;  %v5086_v61 = vld [vmem:[#allocation67_spill] sm:$0xff]  ;;  %v2464_v44 = vld [vmem:[#allocation6] sm:$0xff]  ;;  %v2465_v46 = vld [vmem:[#allocation6 + $0x8] sm:$0xff]  ;;  %v3996_v63 = vmov 5   ;;  %v3998_v7 = vmov 6  }
 0x47e   :  { %3425 = vmatprep.subr.bf16.mxu0 %v5040_v58  ;;  %v1522_v50 = vsel %vm326_vm1, %v1476_v45, 0  ;;  %v5088_v41 = vld [vmem:[#allocation71_spill] sm:$0xff]  ;;  %v3993_v45 = vmov 1   ;;  %2470 = vperm.xlu0 %3498, %v2464_v44  }
 0x47f   :  { %v1608_v13 = vsel %vm326_vm1, %v1477_v31, 0  ;;  %3499 = vset.pattern.permute.xlu1 %v3993_v45  ;;  %v3999_v31 = vmov 7   ;;  %v3700_v45 = vld [vmem:[#allocation14 + $0x64] ss:$8 sps:$4 sm:$0xff]  }
 0x480   :  { %3422 = vmatmul.mubr.msk.bf16.vlgmr.msra.gmra.mrb[8].mxu0 %vm322_vm2, %v5052_v51  ;;  %2491 = vperm.xlu1 %3499, %v2464_v44   ;;  %v3995_v51 = vmov 3  }
 0x481   :  { %3426 = vmatpush3.bf16.msra.mxu0 %v1522_v50  ;;  %3427 = vmatprep.mubr.msk.bf16.mxu0 %vm3992_vm0, %v5040_v58  ;;  %v3994_v50 = vmov 2  }
 0x482   :  { %3431 = vmatprep.subr.bf16.mxu0 %v5040_v58  ;;  %2475 = vperm.xlu0 %3498, %v2465_v46  }
 0x484   :  { %2495 = vperm.xlu1 %3499, %v2465_v46  }
 0x486   :  { %3500 = vset.pattern.permute.xlu0 %v3994_v50 }
 0x487   :  { %2511 = vperm.xlu0 %3500, %v2464_v44  }
 0x488   :  { %3428 = vmatmul.mubr.msk.bf16.vlgmr.msra.gmra.mrb[12].mxu0 %vm322_vm2, %v5053_v12  ;;  %3501 = vset.pattern.permute.xlu1 %v3994_v50  ;;  %v2466_v12 = vld [vmem:[%s4886_s3] sm:$0xff] }
 0x489   :  { %3432 = vmatpush3.bf16.msra.mxu0 %v1565_v47  ;;  %3433 = vmatprep.mubr.msk.bf16.mxu0 %vm3992_vm0, %v5040_v58  ;;  %v3997_v47 = vmov 4   ;;  %v3703_v50 = vld [vmem:[#allocation14 + $0x74] ss:$8 sps:$4 sm:$0xff]  }
 0x48a   :  { %3437 = vmatprep.subr.bf16.mxu0 %v5040_v58  ;;  %2515 = vperm.xlu1 %3501, %v2465_v46  }
 0x48b   :  { %3503 = vset.pattern.permute.xlu0 %v3995_v51 }
 0x48c   :  { %2535 = vperm.xlu0 %3503, %v2465_v46  }
 0x48e   :  { %3502 = vset.pattern.permute.xlu1 %v3995_v51  ;;  %v3701_v51 = vld [vmem:[#allocation14 + $0x70] ss:$8 sps:$4 sm:$0xff]  }
 0x48f   :  { %2531 = vperm.xlu1 %3502, %v2464_v44  }
 0x490   :  { %3434 = vmatmul.mubr.msk.bf16.vlgmr.msra.gmra.mrb[16].mxu0 %vm322_vm2, %v5054_v30  ;;  %3505 = vset.pattern.permute.xlu0 %v3996_v63 }
 0x491   :  { %3438 = vmatpush3.bf16.msra.mxu0 %v1608_v13  ;;  %3439 = vmatprep.mubr.msk.bf16.mxu0 %vm3992_vm0, %v5040_v58  ;;  %v5064_v58 = vld [vmem:[#allocation32_spill] sm:$0xff] }
 0x492   :  { %2336 = vmatprep.subr.bf16.mxu0 %v5055_v14  ;;  %2571 = vperm.xlu0 %3505, %v2464_v44   ;;  %v2467_v13 = vld [vmem:[%s4886_s3 + $0x8] sm:$0xff] }
 0x493   :  { %3504 = vset.pattern.permute.xlu1 %v3997_v47 }
 0x494   :  { %2551 = vperm.xlu1 %3504, %v2464_v44  }
 0x496   :  { %3508 = vset.pattern.permute.xlu0 %v3998_v7 }
 0x497   :  { %2595 = vperm.xlu0 %3508, %v2465_v46  }
 0x498   :  { %3440 = vmatmul.mubr.msk.bf16.vlgmr.msra.gmra.mrb[20].mxu0 %vm322_vm2, %v5056_v16  ;;  %2555 = vperm.xlu1 %3504, %v2465_v46  }
 0x499   :  { %2337 = vmatpush1.bf16.msra.mxu0 %v5057_v19 }
 0x49a   :  { %2338 = vmatprep.subr.bf16.mxu0 %v5058_v49 }
 0x49b   :  { %3510 = vset.pattern.permute.xlu0 %v5020_v28 }
 0x49c   :  { %3506 = vset.pattern.permute.xlu1 %v3996_v63  ;;  %2632 = vperm.xlu0 %3510, %v2466_v12   ;;  %v1748_v63 = vld [vmem:[#allocation12] sm:$0xf] }
 0x49d   :  { %2339 = vmatpush1.bf16.msra.mxu0 %v5059_v24  ;;  %2575 = vperm.xlu1 %3506, %v2465_v46   ;;  %v1753_v47 = vrot.slane %v1748_v63, %v4323_v43 }
 0x49e   :  { %2340 = vmatprep.subr.bf16.mxu0 %v5060_v4 }
 0x4a1   :  { %2341 = vmatpush1.bf16.msra.mxu0 %v5061_v6  ;;  %3507 = vset.pattern.permute.xlu1 %v3998_v7  ;;  %v1757_v7 = vrot.slane %v1748_v63, %v4327_v48 }
 0x4a2   :  { %2342 = vmatprep.subr.bf16.mxu0 %v5062_v1  ;;  %2591 = vperm.xlu1 %3507, %v2464_v44  }
 0x4a5   :  { %2343 = vmatpush1.bf16.msra.mxu0 %v5063_v3 }
 0x4a6   :  { %2344 = vmatprep.subr.bf16.mxu0 %v5064_v58  ;;  %3509 = vset.pattern.permute.xlu1 %v3999_v31 }
 0x4a7   :  { %2611 = vperm.xlu1 %3509, %v2464_v44   ;;  %v3695_v44 = vld [vmem:[#allocation14 + $0x50] ss:$8 sps:$4 sm:$0xff]  }
 0x4a9   :  { %2345 = vmatpush1.bf16.msra.mxu0 %v5065_v8 }
 0x4aa   :  { %2346 = vmatprep.subr.bf16.mxu0 %v5066_v10 }
 0x4ab   :  { %2615 = vperm.xlu1 %3509, %v2465_v46   ;;  %v3698_v46 = vld [vmem:[#allocation14 + $0x60] ss:$8 sps:$4 sm:$0xff]  }
 0x4ad   :  { %2347 = vmatpush1.bf16.msra.mxu0 %v5067_v5 }
 0x4ae   :  { %2348 = vmatprep.subr.bf16.mxu0 %v5068_v33 }
 0x4af   :  { %3511 = vset.pattern.permute.xlu1 %v5020_v28 }
 0x4b0   :  { %2637 = vperm.xlu1 %3511, %v2467_v13  }
 0x4b1   :  { %2349 = vmatpush1.bf16.msra.mxu0 %v5069_v17 }
 0x4b2   :  { %2350 = vmatprep.subr.bf16.mxu0 %v5070_v18 }
 0x4b5   :  { %2351 = vmatpush1.bf16.msra.mxu0 %v5071_v42 }
 0x4b6   :  { %2352 = vmatprep.subr.bf16.mxu0 %v5072_v53  ;;  %v5093_v53 = vld [vmem:[#allocation76_spill] sm:$0xff] }
 0x4b9   :  { %2353 = vmatpush1.bf16.msra.mxu0 %v5073_v20  ;;  %v5094_v20 = vld [vmem:[#allocation77_spill] sm:$0xff] }
 0x4ba   :  { %2354 = vmatprep.subr.bf16.mxu0 %v5074_v0  ;;  %v5100_v0 = vld [vmem:[#allocation83_spill] sm:$0xff] }
 0x4bd   :  { %2355 = vmatpush1.bf16.msra.mxu0 %v5075_v40  ;;  %v5101_v40 = vld [vmem:[#allocation84_spill] sm:$0xff] }
 0x4be   :  { %2356 = vmatprep.subr.bf16.mxu0 %v5076_v39  ;;  %v5102_v39 = vld [vmem:[#allocation85_spill] sm:$0xff] }
 0x4c1   :  { %2357 = vmatpush1.bf16.msra.mxu0 %v5077_v38  ;;  %v5103_v38 = vld [vmem:[#allocation86_spill] sm:$0xff] }
 0x4c2   :  { %2358 = vmatprep.subr.bf16.mxu0 %v5078_v36  ;;  %v5104_v36 = vld [vmem:[#allocation87_spill] sm:$0xff] }
 0x4c5   :  { %2359 = vmatpush1.bf16.msra.mxu0 %v5079_v34  ;;  %v5105_v34 = vld [vmem:[#allocation88_spill] sm:$0xff] }
 0x4c6   :  { %2360 = vmatprep.subr.bf16.mxu0 %v5080_v54  ;;  %v5106_v54 = vld [vmem:[#allocation89_spill] sm:$0xff] }
 0x4c9   :  { %2361 = vmatpush1.bf16.msra.mxu0 %v5081_v55  ;;  %v5107_v55 = vld [vmem:[#allocation90_spill] sm:$0xff] }
 0x4ca   :  { %2362 = vmatprep.subr.bf16.mxu0 %v5082_v56  ;;  %v3685_v56 = vld [vmem:[#allocation14 + $0x14] ss:$8 sps:$4 sm:$0xff]  }
 0x4cd   :  { %2363 = vmatpush1.bf16.msra.mxu0 %v5083_v57  ;;  %v3683_v57 = vld [vmem:[#allocation14 + $0x10] ss:$8 sps:$4 sm:$0xff]  }
 0x4ce   :  { %2364 = vmatprep.subr.bf16.mxu0 %v5084_v59  ;;  %v3688_v59 = vld [vmem:[#allocation14 + $0x24] ss:$8 sps:$4 sm:$0xff]  }
 0x4d1   :  { %2365 = vmatpush1.bf16.msra.mxu0 %v5085_v60  ;;  %v3686_v60 = vld [vmem:[#allocation14 + $0x20] ss:$8 sps:$4 sm:$0xff]  }
 0x4d2   :  { %2366 = vmatprep.subr.bf16.mxu0 %v5086_v61  ;;  %v3691_v61 = vld [vmem:[#allocation14 + $0x34] ss:$8 sps:$4 sm:$0xff]  }
 0x4d5   :  { %2367 = vmatpush1.bf16.msra.mxu0 %v5087_v62  ;;  %v3689_v62 = vld [vmem:[#allocation14 + $0x30] ss:$8 sps:$4 sm:$0xff]  }
 0x4d6   :  { %2379 = vmatprep.subr.bf16.mxu0 %v5088_v41  ;;  %v3694_v41 = vld [vmem:[#allocation14 + $0x44] ss:$8 sps:$4 sm:$0xff]  }
 0x553   :  { %v1515_v30 = vpop.f32.mrb[8].mxu0 }
 0x554   :  { %v3423_v14 = vpop.f32.mrb[9].mxu0 }
 0x555   :  { %v1518_v16 = vpop.f32.mrb[10].mxu0 }
 0x556   :  { %v3424_v19 = vpop.f32.mrb[11].mxu0 }
 0x55b   :  { %v1558_v49 = vpop.f32.mrb[12].mxu0 }
 0x55c   :  { %v1650_v24 = vpack.c.bf16 %v1558_v49, %v1515_v30  ;;  %v3429_v4 = vpop.f32.mrb[13].mxu0 }
 0x55d   :  { %v1561_v6 = vpop.f32.mrb[14].mxu0 }
 0x55e   :  { %v3430_v1 = vpop.f32.mrb[15].mxu0 }
 0x563   :  { %v1601_v3 = vpop.f32.mrb[16].mxu0 }
 0x564   :  { %v3435_v58 = vpop.f32.mrb[17].mxu0 }
 0x565   :  { %v1604_v8 = vpop.f32.mrb[18].mxu0 }
 0x566   :  { %v3436_v10 = vpop.f32.mrb[19].mxu0 }
 0x56b   :  { %v1644_v5 = vpop.f32.mrb[20].mxu0 }
 0x56c   :  { %v1651_v33 = vpack.c.bf16 %v1644_v5, %v1601_v3  ;;  %v3441_v17 = vpop.f32.mrb[21].mxu0  ;;  %v2492_v5 = vpop.permute.xlu1 %2491 }
 0x56d   :  { %v1647_v18 = vpop.f32.mrb[22].mxu0 }
 0x56e   :  { %2282 = vmatprep.mubr.bf16.mxu1 %v1651_v33  ;;  %2368 = vmatprep.mubr.bf16.mxu0 %v1651_v33  ;;  %v3442_v42 = vpop.f32.mrb[23].mxu0 }
 0x56f   :  { %2283 = vmatmul.mubr.bf16.vlgmr.msra.gmra.mrb[24].mxu1 %v1650_v24  ;;  %2369 = vmatmul.mubr.bf16.vlgmr.msra.gmra.mrb[24].mxu0 %v1650_v24 }
 0x570   :  { %2294 = vmatpush1.bf16.msra.mxu1 %v4509_v32  ;;  %2380 = vmatpush1.bf16.msra.mxu0 %v4511_v26  ;;  %v5089_v32 = vld [vmem:[#allocation72_spill] sm:$0xff]  ;;  %v5090_v26 = vld [vmem:[#allocation73_spill] sm:$0xff]  ;;  %v2496_v33 = vpop.permute.xlu1 %2495 }
 0x571   :  { %2295 = vmatprep.subr.bf16.mxu1 %v4513_v52  ;;  %2381 = vmatprep.subr.bf16.mxu0 %v4515_v22  ;;  %v5091_v52 = vld [vmem:[#allocation74_spill] sm:$0xff]  ;;  %v5092_v22 = vld [vmem:[#allocation75_spill] sm:$0xff] }
 0x572   :  { %2325 = vmatprep.mubr.bf16.mxu1 %v5020_v28  ;;  %2411 = vmatprep.mubr.bf16.mxu0 %v5020_v28 }
 0x574   :  { %2296 = vmatpush1.bf16.msra.mxu1 %v4519_v23  ;;  %2382 = vmatpush1.bf16.msra.mxu0 %v4521_v25  ;;  %v5095_v23 = vld [vmem:[#allocation78_spill] sm:$0xff]  ;;  %v5096_v25 = vld [vmem:[#allocation79_spill] sm:$0xff] }
 0x575   :  { %2297 = vmatprep.subr.bf16.mxu1 %v4525_v21  ;;  %2383 = vmatprep.subr.bf16.mxu0 %v4527_v27  ;;  %v5097_v21 = vld [vmem:[#allocation80_spill] sm:$0xff]  ;;  %v5098_v27 = vld [vmem:[#allocation81_spill] sm:$0xff] }
 0x578   :  { %2298 = vmatpush1.bf16.msra.mxu1 %v4533_v29  ;;  %2384 = vmatpush1.bf16.msra.mxu0 %v5089_v32  ;;  %v5099_v29 = vld [vmem:[#allocation82_spill] sm:$0xff] }
 0x579   :  { %2299 = vmatprep.subr.bf16.mxu1 %v5090_v26  ;;  %2385 = vmatprep.subr.bf16.mxu0 %v5091_v52  ;;  %v4778_v52 = vpop.permute.xlu1 %2515 }
 0x57c   :  { %2300 = vmatpush1.bf16.msra.mxu1 %v5092_v22  ;;  %2386 = vmatpush1.bf16.msra.mxu0 %v5093_v53 }
 0x57d   :  { %2301 = vmatprep.subr.bf16.mxu1 %v5094_v20  ;;  %2387 = vmatprep.subr.bf16.mxu0 %v5095_v23  ;;  %v5108_v20 = vld [vmem:[#allocation91_spill] sm:$0xff] }
 0x57e   :  { %v1765_v23 = vrot.slane %v1748_v63, %v5108_v20 }
 0x580   :  { %2302 = vmatpush1.bf16.msra.mxu1 %v5096_v25  ;;  %2388 = vmatpush1.bf16.msra.mxu0 %v5097_v21  ;;  %v1761_v25 = vrot.slane %v1748_v63, %v4630_v2 }
 0x581   :  { %2303 = vmatprep.subr.bf16.mxu1 %v5098_v27  ;;  %2389 = vmatprep.subr.bf16.mxu0 %v5099_v29  ;;  %v2532_v27 = vpop.permute.xlu1 %2531 }
 0x584   :  { %2304 = vmatpush1.bf16.msra.mxu1 %v5100_v0  ;;  %2390 = vmatpush1.bf16.msra.mxu0 %v4571_v35  ;;  %v3682_v35 = vld [vmem:[#allocation14 + $0x4] ss:$8 sps:$4 sm:$0xff]  }
 0x585   :  { %2305 = vmatprep.subr.bf16.mxu1 %v4575_v37  ;;  %2391 = vmatprep.subr.bf16.mxu0 %v5101_v40  ;;  %v3680_v37 = vld [vmem:[#allocation14] ss:$8 sps:$4 sm:$0xff]  }
 0x588   :  { %2306 = vmatpush1.bf16.msra.mxu1 %v5102_v39  ;;  %2392 = vmatpush1.bf16.msra.mxu0 %v5103_v38 }
 0x589   :  { %2307 = vmatprep.subr.bf16.mxu1 %v5104_v36  ;;  %2393 = vmatprep.subr.bf16.mxu0 %v5105_v34  ;;  %v2471_v34 = vpop.permute.xlu0 %2470 }
 0x58c   :  { %2308 = vmatpush1.bf16.msra.mxu1 %v5106_v54  ;;  %2394 = vmatpush1.bf16.msra.mxu0 %v5107_v55 }
 0x58d   :  { %2763 = vmatprep.subr.bf16.mxu1 %v3682_v35 }
 0x58f   :  { %2326 = vmatmul.mubr.bf16.vlgmr.msra.gmra.mrb[24].mxu1 %v4642_v11  ;;  %2412 = vmatmul.mubr.bf16.vlgmr.msra.gmra.mrb[24].mxu0 %v4642_v11  ;;  %v3692_v11 = vld [vmem:[#allocation14 + $0x40] ss:$8 sps:$4 sm:$0xff]  }
 0x590   :  { %2795 = vmatprep.mubr.bf16.mxu1 %v5020_v28  ;;  %2764 = vmatpush1.bf16.msra.mxu1 %v3680_v37  ;;  %v3697_v28 = vld [vmem:[#allocation14 + $0x54] ss:$8 sps:$4 sm:$0xff]   ;;  %v2552_v37 = vpop.permute.xlu1 %2551 }
 0x591   :  { %2765 = vmatprep.subr.bf16.mxu1 %v3685_v56 }
 0x594   :  { %2766 = vmatpush1.bf16.msra.mxu1 %v3683_v57  ;;  %v2476_v57 = vpop.permute.xlu0 %2475 }
 0x595   :  { %2767 = vmatprep.subr.bf16.mxu1 %v3688_v59 }
 0x598   :  { %2768 = vmatpush1.bf16.msra.mxu1 %v3686_v60  ;;  %v2556_v60 = vpop.permute.xlu1 %2555 }
 0x599   :  { %2769 = vmatprep.subr.bf16.mxu1 %v3691_v61 }
 0x59c   :  { %2770 = vmatpush1.bf16.msra.mxu1 %v3689_v62 }
 0x59d   :  { %2771 = vmatprep.subr.bf16.mxu1 %v3694_v41 }
 0x5a0   :  { %2772 = vmatpush1.bf16.msra.mxu1 %v3692_v11  ;;  %v2512_v11 = vpop.permute.xlu0 %2511 }
 0x5a1   :  { %2773 = vmatprep.subr.bf16.mxu1 %v3697_v28 }
 0x5a4   :  { %2774 = vmatpush1.bf16.msra.mxu1 %v3695_v44 }
 0x5a5   :  { %2775 = vmatprep.subr.bf16.mxu1 %v3700_v45 }
 0x5a8   :  { %2776 = vmatpush1.bf16.msra.mxu1 %v3698_v46  ;;  %v2576_v46 = vpop.permute.xlu1 %2575 }
 0x5a9   :  { %2777 = vmatprep.subr.bf16.mxu1 %v3703_v50 }
 0x5ac   :  { %2778 = vmatpush1.bf16.msra.mxu1 %v3701_v51 }
 0x662   :  { %v2327_v12 = vpop.f32.mrb[24].mxu1  ;;  %v2413_v31 = vpop.f32.mrb[24].mxu0 }
 0x663   :  { %v3451_v13 = vadd.f32 %v2327_v12, %v1753_v47  ;;  %v2329_v30 = vpop.f32.mrb[25].mxu1  ;;  %v2415_v14 = vpop.f32.mrb[25].mxu0  ;;  %v3455_v40 = vadd.f32 %v2413_v31, %v1761_v25  ;;  %v5109_v31 = vld [vmem:[#allocation44_spill] sm:$0xff] }
 0x664   :  { %v3452_v16 = vadd.f32 %v2329_v30, %v1757_v7  ;;  %v2331_v19 = vpop.f32.mrb[26].mxu1  ;;  %v2417_v49 = vpop.f32.mrb[26].mxu0  ;;  %v3456_v29 = vadd.f32 %v2415_v14, %v1765_v23 }
 0x665   :  { %v3317_v24 = vmul.f32 -1.442695, %v3451_v13  ;;  %v3453_v4 = vadd.f32 %v2331_v19, %v1753_v47  ;;  %v2333_v6 = vpop.f32.mrb[27].mxu1  ;;  %v2419_v1 = vpop.f32.mrb[27].mxu0  ;;  %v3457_v55 = vadd.f32 %v2417_v49, %v1761_v25  ;;  %v2560_v13 = vsub.s32 4, %v5109_v31 }
 0x666   :  { %v3454_v3 = vadd.f32 %v2333_v6, %v1757_v7  ;;  %v3319_v8 = vmul.f32 -1.442695, %v3452_v16  ;;  %v3458_v38 = vadd.f32 %v2419_v1, %v1765_v23  ;;  %v2536_v30 = vpop.permute.xlu0 %2535  ;;  %v2580_v1 = vsub.s32 5, %v5109_v31 }
 0x667   :  { %3740 = vpow2.f32 %v3317_v24  ;;  %v3318_v58 = vmul.f32 -1.442695, %v3453_v4  ;;  %v2592_v24 = vpop.permute.xlu1 %2591 }
 0x668   :  { %v3320_v10 = vmul.f32 -1.442695, %v3454_v3 }
 0x669   :  { %3742 = vpow2.f32 %v3318_v58 }
 0x66a   :  { %3744 = vpow2.f32 %v3319_v8  ;;  %v2600_v8 = vsub.s32 6, %v5109_v31 }
 0x66b   :  { %3746 = vpow2.f32 %v3320_v10 }
 0x671   :  { %v3741_v17 = vpop.eup %3740 }
 0x672   :  { %v2428_v18 = vadd.f32 1.0, %v3741_v17 }
 0x673   :  { %v3743_v42 = vpop.eup %3742 }
 0x674   :  { %3748 = vrcp.f32 %v2428_v18  ;;  %v2429_v32 = vadd.f32 1.0, %v3743_v42  ;;  %v3745_v26 = vpop.eup %3744 }
 0x675   :  { %v3747_v22 = vpop.eup %3746  ;;  %v2440_v53 = vadd.f32 1.0, %v3745_v26  ;;  %v2620_v26 = vsub.s32 7, %v5109_v31 }
 0x676   :  { %3750 = vrcp.f32 %v2429_v32  ;;  %v2441_v21 = vadd.f32 1.0, %v3747_v22  ;;  %v2572_v22 = vpop.permute.xlu0 %2571 }
 0x677   :  { %3752 = vrcp.f32 %v2440_v53 }
 0x678   :  { %3754 = vrcp.f32 %v2441_v21 }
 0x67e   :  { %v3749_v0 = vpop.eup %3748 }
 0x67f   :  { %v2446_v39 = vmul.f32 %v3749_v0, %v3456_v29  ;;  %v2612_v29 = vpop.permute.xlu1 %2611 }
 0x680   :  { %v3751_v36 = vpop.eup %3750 }
 0x681   :  { %v2448_v54 = vadd.f32 %v3455_v40, %v2446_v39  ;;  %v2447_v35 = vmul.f32 %v3751_v36, %v3458_v38  ;;  %v3753_v59 = vpop.eup %3752 }
 0x682   :  { %v3755_v61 = vpop.eup %3754  ;;  %v2452_v62 = vsub.f32 1.0, %v3753_v59 }
 0x683   :  { %3756 = vtanh.f32 %v2448_v54  ;;  %v2449_v56 = vadd.f32 %v3457_v55, %v2447_v35  ;;  %v2453_v41 = vsub.f32 1.0, %v3755_v61 }
 0x684   :  { %v2454_v44 = vmul.f32 %v2452_v62, %v4636_v15  ;;  %v2616_v62 = vpop.permute.xlu1 %2615 }
 0x685   :  { %3758 = vtanh.f32 %v2449_v56  ;;  %v2455_v63 = vmul.f32 %v2453_v41, %v4638_v9  ;;  %v2596_v56 = vpop.permute.xlu0 %2595 }
 0x68d   :  { %v3757_v28 = vpop.eup %3756 }
 0x68e   :  { %v2456_v45 = vmul.f32 %v3757_v28, %v3753_v59 }
 0x68f   :  { %v3759_v50 = vpop.eup %3758 }
 0x690   :  { %v2458_v51 = vadd.f32 %v2456_v45, %v2454_v44  ;;  %v2457_v47 = vmul.f32 %v3759_v50, %v3755_v61  ;;  %v2633_v44 = vpop.permute.xlu0 %2632 }
 0x692   :  { %v2459_v7 = vadd.f32 %v2457_v47, %v2455_v63  ;;  %v2501_v12 = vrot.slane %v2458_v51, %v4327_v48  ;;  %v2481_v14 = vrot.slane %v2458_v51, %v4323_v43  ;;  %v2521_v16 = vrot.slane %v2458_v51, %v4630_v2 }
 0x693   :  { %v2541_v49 = vrot.slane %v2458_v51, %v5108_v20  ;;  %v2561_v58 = vrot.slane %v2458_v51, %v2560_v13  ;;  %v2581_v25 = vrot.slane %v2458_v51, %v2580_v1 }
 0x694   :  { %v2506_v19 = vmul.f32 %v2501_v12, %v2492_v5  ;;  %v2505_v15 = vrot.slane %v2459_v7, %v4327_v48  ;;  %v2525_v4 = vrot.slane %v2459_v7, %v4630_v2  ;;  %v2486_v9 = vmul.f32 %v2481_v14, %v2471_v34 }
 0x695   :  { %v2485_v6 = vrot.slane %v2459_v7, %v4323_v43  ;;  %v2526_v18 = vmul.f32 %v2521_v16, %v2512_v11  ;;  %v2546_v5 = vmul.f32 %v2541_v49, %v2532_v27  ;;  %v2565_v42 = vrot.slane %v2459_v7, %v2560_v13 }
 0x696   :  { %v2507_v3 = vmul.f32 %v2505_v15, %v2496_v33  ;;  %v2508_v10 = vadd.f32 %v2506_v19, %v2486_v9  ;;  %v2545_v32 = vrot.slane %v2459_v7, %v5108_v20  ;;  %v2527_v2 = vmul.f32 %v2525_v4, %v4778_v52 }
 0x697   :  { %v2487_v17 = vmul.f32 %v2485_v6, %v2476_v57  ;;  %v2566_v21 = vmul.f32 %v2561_v58, %v2552_v37  ;;  %v2601_v33 = vrot.slane %v2458_v51, %v2600_v8  ;;  %v2585_v0 = vrot.slane %v2459_v7, %v2580_v1  ;;  %v3705_v58 = vld [vmem:[%s4895_s12] sm:$0xff]  }
 0x698   :  { %v2528_v23 = vadd.f32 %v2526_v18, %v2508_v10  ;;  %v2547_v38 = vmul.f32 %v2545_v32, %v2536_v30  ;;  %v2567_v36 = vmul.f32 %v2565_v42, %v2556_v60  ;;  %v2621_v27 = vrot.slane %v2458_v51, %v2620_v26  ;;  %v2638_v51 = vpop.permute.xlu1 %2637  ;;  %v2671_v10 = vld [vmem:[#allocation15] sm:$0x3] }
 0x699   :  { %v2509_v53 = vadd.f32 %v2507_v3, %v2487_v17  ;;  %v2586_v20 = vmul.f32 %v2581_v25, %v2572_v22  ;;  %v2605_v55 = vrot.slane %v2459_v7, %v2600_v8  ;;  %v2606_v35 = vmul.f32 %v2601_v33, %v2592_v24  ;;  %v3704_v3 = vld [vmem:[%s4895_s12 + $0x40] sm:$0xff]   ;;  %v3706_v8 = vld [vmem:[%s4895_s12 + $0x48] sm:$0xff]  }
 0x69a   :  { %v2548_v40 = vadd.f32 %v2546_v5, %v2528_v23  ;;  %v2587_v57 = vmul.f32 %v2585_v0, %v2576_v46  ;;  %v2625_v61 = vrot.slane %v2459_v7, %v2620_v26  ;;  %v2626_v37 = vmul.f32 %v2621_v27, %v2612_v29  ;;  %3373 = vmatprep.subr.bf16.mxu0 %v3704_v3 }
 0x69b   :  { %v2529_v39 = vadd.f32 %v2527_v2, %v2509_v53  ;;  %v2607_v28 = vmul.f32 %v2605_v55, %v2596_v56  ;;  %3374 = vmatpush3.bf16.msra.mxu0 %v3705_v58  ;;  %v2680_v17 = vrot.slane %v2671_v10, %v4327_v48  ;;  %v2676_v0 = vrot.slane %v2671_v10, %v4323_v43 }
 0x69c   :  { %v2568_v54 = vadd.f32 %v2566_v21, %v2548_v40  ;;  %v2627_v45 = vmul.f32 %v2625_v61, %v2616_v62  ;;  %3375 = vmatprep.subr.bf16.mxu0 %v3706_v8  ;;  %v3339_v62 = vld [vmem:[%s4894_s11] ss:$0 sm:$0xff] }
 0x69d   :  { %v2549_v34 = vadd.f32 %v2547_v38, %v2529_v39 }
 0x69e   :  { %v2588_v59 = vadd.f32 %v2586_v20, %v2568_v54 }
 0x69f   :  { %v2569_v52 = vadd.f32 %v2567_v36, %v2549_v34 }
 0x6a0   :  { %v2608_v41 = vadd.f32 %v2606_v35, %v2588_v59 }
 0x6a1   :  { %v2589_v11 = vadd.f32 %v2587_v57, %v2569_v52 }
 0x6a2   :  { %v4797_v60 = vadd.f32 %v2626_v37, %v2608_v41 }
 0x6a3   :  { %v2609_v50 = vadd.f32 %v2607_v28, %v2589_v11 }
 0x6a4   :  { %v2640_v47 = vmul.f32 %v2633_v44, %v4797_v60 }
 0x6a5   :  { %v4799_v63 = vadd.f32 %v2627_v45, %v2609_v50  ;;  %v3707_v45 = vld [vmem:[%s4895_s12 + $0x8] sm:$0xff]   ;;  %v3708_v50 = vld [vmem:[%s4895_s12 + $0x50] sm:$0xff]  }
 0x6a6   :  { %v2642_v12 = vrot.slane %v2640_v47, 4  ;;  %3376 = vmatpush3.bf16.msra.mxu0 %v3707_v45 }
 0x6a7   :  { %v2641_v46 = vmul.f32 %v2638_v51, %v4799_v63  ;;  %v2654_v7 = vpack.c.bf16 %v4799_v63, %v4797_v60  ;;  %3377 = vmatprep.subr.bf16.mxu0 %v3708_v50 }
 0x6a8   :  { %v2643_v31 = vadd.f32 %v2642_v12, %v2640_v47  ;;  %v3709_v47 = vld [vmem:[%s4895_s12 + $0x10] sm:$0xff]   ;;  %v3710_v12 = vld [vmem:[%s4895_s12 + $0x58] sm:$0xff]  }
 0x6a9   :  { %v2648_v13 = vrot.slane %v2641_v46, 4  ;;  %2796 = vmatmul.mubr.bf16.vlgmr.msra.gmra.mrb[28].mxu1 %v2654_v7  ;;  %v3712_v7 = vld [vmem:[%s4895_s12 + $0x60] sm:$0xff]  }
 0x6aa   :  { %v2644_v30 = vrot.slane %v2643_v31, 2  ;;  %3378 = vmatpush3.bf16.msra.mxu0 %v3709_v47 }
 0x6ab   :  { %v2649_v14 = vadd.f32 %v2648_v13, %v2641_v46  ;;  %v3711_v46 = vld [vmem:[%s4895_s12 + $0x18] sm:$0xff]   ;;  %3379 = vmatprep.subr.bf16.mxu0 %v3710_v12  ;;  %v3714_v13 = vld [vmem:[%s4895_s12 + $0x68] sm:$0xff]  }
 0x6ac   :  { %v2645_v16 = vadd.f32 %v2644_v30, %v2643_v31  ;;  %v3713_v31 = vld [vmem:[%s4895_s12 + $0x20] sm:$0xff]   ;;  %v3715_v30 = vld [vmem:[%s4895_s12 + $0x28] sm:$0xff]  }
 0x6ad   :  { %v2650_v19 = vrot.slane %v2649_v14, 2 }
 0x6ae   :  { %v2646_v15 = vrot.slane %v2645_v16, 1  ;;  %3380 = vmatpush3.bf16.msra.mxu0 %v3711_v46 }
 0x6af   :  { %v2651_v49 = vadd.f32 %v2650_v19, %v2649_v14  ;;  %3381 = vmatprep.subr.bf16.mxu0 %v3712_v7  ;;  %v3716_v14 = vld [vmem:[%s4895_s12 + $0x70] sm:$0xff]   ;;  %v3718_v19 = vld [vmem:[%s4895_s12 + $0x78] sm:$0xff]  }
 0x6b0   :  { %v2647_v4 = vadd.f32 %v2646_v15, %v2645_v16  ;;  %v3717_v16 = vld [vmem:[%s4895_s12 + $0x30] sm:$0xff]   ;;  %v3719_v15 = vld [vmem:[%s4895_s12 + $0x38] sm:$0xff]  }
 0x6b1   :  { %v2652_v24 = vrot.slane %v2651_v49, 1 }
 0x6b2   :  { %3382 = vmatpush3.bf16.msra.mxu0 %v3713_v31 }
 0x6b3   :  { %v2653_v9 = vadd.f32 %v2652_v24, %v2651_v49  ;;  %3383 = vmatprep.subr.bf16.mxu0 %v3714_v13 }
 0x6b5   :  { %v2882_v6 = vsel %vm2877_vm3, %v2653_v9, %v2647_v4 }
 0x6b6   :  { %v2885_v1 = vpack.c.bf16 %v2882_v6, %v2882_v6  ;;  %3384 = vmatpush3.bf16.msra.mxu0 %v3715_v30 }
 0x6b7   :  { %3385 = vmatprep.subr.bf16.mxu0 %v3716_v14 }
 0x6b8   :  { %3053 = vmatprep.mubr.bf16.mxu0 %v2885_v1 }
 0x6ba   :  { %3386 = vmatpush3.bf16.msra.mxu0 %v3717_v16 }
 0x6bb   :  { %3387 = vmatprep.subr.bf16.mxu0 %v3718_v19 }
 0x6be   :  { %3388 = vmatpush3.bf16.msra.mxu0 %v3719_v15 }
 0x77c   :  { %v2797_v18 = vpop.f32.mrb[28].mxu1 }
 0x77d   :  { %v2799_v5 = vpop.f32.mrb[29].mxu1  ;;  %v2798_v48 = vadd.f32 %v2797_v18, %v2676_v0 }
 0x77e   :  { %v2800_v42 = vadd.f32 %v2799_v5, %v2680_v17  ;;  %v2801_v32 = vpop.f32.mrb[30].mxu1 }
 0x77f   :  { %v2803_v26 = vpop.f32.mrb[31].mxu1  ;;  %v2802_v20 = vadd.f32 %v2801_v32, %v2676_v0 }
 0x780   :  { %v2806_v22 = vmul.f32 %v2800_v42, %v2633_v44  ;;  %v2804_v2 = vadd.f32 %v2803_v26, %v2680_v17  ;;  %v2850_v44 = vld [vmem:[%s4887_s4 + $0x8] sm:$0xff] }
 0x782   :  { %v2808_v53 = vrot.slane %v2806_v22, 4  ;;  %v2807_v23 = vmul.f32 %v2804_v2, %v2638_v51  ;;  %v2849_v51 = vld [vmem:[%s4887_s4] sm:$0xff] }
 0x784   :  { %v2809_v25 = vadd.f32 %v2808_v53, %v2806_v22  ;;  %v2814_v21 = vrot.slane %v2807_v23, 4 }
 0x786   :  { %v2810_v33 = vrot.slane %v2809_v25, 2  ;;  %v2815_v29 = vadd.f32 %v2814_v21, %v2807_v23 }
 0x788   :  { %v2811_v40 = vadd.f32 %v2810_v33, %v2809_v25  ;;  %v2816_v39 = vrot.slane %v2815_v29, 2 }
 0x78a   :  { %v2812_v38 = vrot.slane %v2811_v40, 1  ;;  %v2817_v36 = vadd.f32 %v2816_v39, %v2815_v29 }
 0x78c   :  { %v2813_v27 = vadd.f32 %v2812_v38, %v2811_v40  ;;  %v2818_v34 = vrot.slane %v2817_v36, 1 }
 0x78e   :  { %v2820_v54 = vadd.f32 %v2813_v27, %v2798_v48  ;;  %v2819_v55 = vadd.f32 %v2818_v34, %v2817_v36 }
 0x790   :  { %v3337_v35 = vmul.f32 -1.442695, %v2820_v54  ;;  %v2821_v56 = vadd.f32 %v2819_v55, %v2802_v20 }
 0x792   :  { %3760 = vpow2.f32 %v3337_v35  ;;  %v3338_v57 = vmul.f32 -1.442695, %v2821_v56 }
 0x794   :  { %3762 = vpow2.f32 %v3338_v57 }
 0x79c   :  { %v3761_v52 = vpop.eup %3760 }
 0x79d   :  { %v2828_v59 = vadd.f32 1.0, %v3761_v52 }
 0x79e   :  { %v3763_v61 = vpop.eup %3762 }
 0x79f   :  { %3764 = vrcp.f32 %v2828_v59  ;;  %v2829_v43 = vadd.f32 1.0, %v3763_v61 }
 0x7a1   :  { %3766 = vrcp.f32 %v2829_v43 }
 0x7a9   :  { %v3765_v37 = vpop.eup %3764 }
 0x7aa   :  { %v2841_v41 = vmul.f32 %v3765_v37, %v3339_v62 }
 0x7ab   :  { %v3767_v11 = vpop.eup %3766 }
 0x7ac   :  { %2843 = vadd.xlane.f32.xlu1 %v2841_v41  ;;  %v2842_v28 = vmul.f32 %v3767_v11, %v3339_v62 }
 0x7ae   :  { %2845 = vadd.xlane.f32.xlu0 %v2842_v28 }
 0x7bd   :  { %2858 = vperm.xlu1 %3511, %v2850_v44  }
 0x7c4   :  { %2853 = vperm.xlu0 %3510, %v2849_v51  }
 0x839   :  { %v2844_v49 = vpop.xlane.xlu1 %2843 }
 0x83a   :  { %v2847_v3 = vmul.f32 %v2844_v49, %v4797_v60  ;;  %v3340_v60 = vld [vmem:[%s4896_s13] ss:$0 sm:$0xff] }
 0x83b   :  { %v2846_v24 = vpop.xlane.xlu0 %2845 }
 0x83c   :  { %v2848_v4 = vmul.f32 %v2846_v24, %v4799_v63 }
 0x83d   :  { %v2859_v9 = vpop.permute.xlu1 %2858 }
 0x83e   :  { %v2862_v6 = vmul.f32 %v2859_v9, %v2848_v4 }
 0x840   :  { %v2869_v1 = vrot.slane %v2862_v6, 4 }
 0x842   :  { %v2870_v58 = vadd.f32 %v2869_v1, %v2862_v6 }
 0x843   :  { %v2854_v8 = vpop.permute.xlu0 %2853 }
 0x844   :  { %v2871_v10 = vrot.slane %v2870_v58, 2  ;;  %v2861_v17 = vmul.f32 %v2854_v8, %v2847_v3 }
 0x846   :  { %v2863_v18 = vrot.slane %v2861_v17, 4  ;;  %v2872_v5 = vadd.f32 %v2871_v10, %v2870_v58 }
 0x848   :  { %v2864_v42 = vadd.f32 %v2863_v18, %v2861_v17  ;;  %v2873_v26 = vrot.slane %v2872_v5, 1 }
 0x84a   :  { %v2865_v32 = vrot.slane %v2864_v42, 2  ;;  %v2874_v53 = vadd.f32 %v2873_v26, %v2872_v5 }
 0x84c   :  { %v2866_v22 = vadd.f32 %v2865_v32, %v2864_v42 }
 0x84e   :  { %v2867_v2 = vrot.slane %v2866_v22, 1 }
 0x850   :  { %v2868_v23 = vadd.f32 %v2867_v2, %v2866_v22 }
 0x852   :  { %v2878_v63 = vsel %vm2877_vm3, %v2874_v53, %v2868_v23 }
 0x853   :  { %v2884_v25 = vpack.c.bf16 %v2878_v63, %v2878_v63 }
 0x855   :  { %3054 = vmatmul.mubr.bf16.vlgmr.msra.gmra.mrb[28].mxu0 %v2884_v25 }
 0x928   :  { %v3389_v21 = vpop.f32.mrb[28].mxu0 }
 0x929   :  { %v3390_v33 = vpop.f32.mrb[29].mxu0 }
 0x92a   :  { %v3391_v29 = vadd.f32 %v3390_v33, %v3389_v21  ;;  %v3392_v0 = vpop.f32.mrb[30].mxu0 }
 0x92b   :  { %v3393_v40 = vpop.f32.mrb[31].mxu0 }
 0x92c   :  { %v3056_v39 = vadd.f32 %v3391_v29, %v3340_v60 }
 0x92e   :  { %3061 = vst [vmem:[#allocation17] sm:$0x3] %v3056_v39 }
 0x92f   :  { %3955 = shalt.err (!%p3952_p12)
}
 0x930   :  { %s3956_s13 = scalar_lea.hbm %s4897_s14, 32 }
 0x931   :  { %p3957_p13 = scmp.ne.s32.totalorder %s4897_s14, %s3956_s13  ;;  %p3960_p0 = scmp.lt.u32.totalorder %s3956_s13, %s4897_s14 }
 0x933   :  { %p3962_p1 = pnand %p3960_p0, %p3957_p13 }
 0x935   :  { %3965 = shalt.err (!%p3962_p1)
}
 0x936   :  { %3071 = dma.vmem_to_hbm [thread:$0]  %s3069_s9, 32, %s4897_s14, [#allocation5]  }
 0x937   :  { %3976 = dma.done.wait [#allocation5], 32  }
 0x938   :  { %3977 = vsyncadd [#allocation5], 4294967264 }
 0x939   :  { %3075 = vsyncpa [#allocation4], 1 }
 0x93a   :  { %3076 = vsyncpa [#allocation7], 1 }
 0x93b   :  { %3077 = vsyncpa [#allocation10], 1 }
 0x93c   :  { %3078 = vsyncpa [#allocation13], 1 }
 0x93d   :  { %3079 = vsyncpa [#allocation16], 1 }
 0x93e   :  { %3080 = vsyncpa [#allocation5], 1 }

</bundles_post_ra>
